<compile_context>
chip_gen: v6e
topology: v6e:2x2x1
jax: 0.10.0
libtpu: 0.0.40
codegen_flags: <defaults>
</compile_context>

<pallas_src>
import functools

import jax
import jax.numpy as jnp
from jax import lax
from jax.experimental import pallas as pl
from jax.experimental.pallas import tpu as pltpu

KERNEL_SIZES = (9, 19, 39)
MAX_PAD = KERNEL_SIZES[-1] // 2          # 19
NUM_SHIFTS = 2 * MAX_PAD + 1             # 39 effective taps after branch merge
BN_EPS = 1e-5


def _round8(n):
    return -(-n // 8) * 8


# ----------------------------- fused kernel ---------------------------------

def _block_kernel(x_ref, t1_ref, t2_ref, t3_ref,
                  wm1_ref, wmpr1_ref, g1_ref, b1_ref,
                  wm2_ref, wmp2_ref, g2_ref, b2_ref,
                  wm3_ref, wmp3_ref, g3_ref, b3_ref,
                  rb_ref, rg_ref, rbeta_ref,
                  out_ref, *, B, LB):
    """Whole InceptionTransposeBlock forward; everything resident in VMEM."""
    LBp = x_ref.shape[1]                      # lane-padded L*B (multiple of 128)
    halo_w = MAX_PAD * B
    col = lax.broadcasted_iota(jnp.int32, (1, LBp), 1)
    valid = col < LB                          # dead lanes excluded everywhere
    inv_n = 1.0 / LB

    def batchnorm(t, gamma, beta):
        # Training-mode BatchNorm1d: biased stats over (N, L) = valid lanes.
        # Single masked pass: sum and sum-of-squares together.
        # TODO(synk): running-mean/var buffers (inference mode) not updated.
        tm = jnp.where(valid, t, 0.0)
        mean = jnp.sum(tm, axis=1, keepdims=True) * inv_n
        var = jnp.sum(tm * tm, axis=1, keepdims=True) * inv_n - mean * mean
        var = jnp.maximum(var, 0.0)
        return (t - mean) * lax.rsqrt(var + BN_EPS) * gamma + beta

    def unpool(z4, tgt):
        # MaxUnpool1d(kernel=3, stride=1, padding=1): every target satisfies
        # |tgt_l - src_l| <= 1, i.e. destination column is src-B, src or src+B
        # in the interleaved layout -> three masked lane rotations, no one-hot.
        # Wrap-around of the rotation never carries live data (masks are false
        # at the boundaries for genuine pooling indices).
        # TODO(synk): colliding indices are summed; PyTorch keeps one value.
        # TODO(synk): out-of-range indices are dropped instead of erroring.
        out = jnp.where(tgt == col, z4, 0.0)
        for delta in (B, -B):
            contrib = jnp.where(tgt == col + delta, z4, 0.0)
            out = out + pltpu.roll(contrib, shift=delta % LBp, axis=1)
        return out

    def inception(y_b16, tgt, wm, z4, gamma, beta):
        c = y_b16.shape[0]
        c8 = _round8(c)
        if c8 != c:
            # pad channels to a sublane multiple so every im2col shift block
            # is (8k, LBp)-aligned (wm carries matching zero columns)
            y_b16 = jnp.concatenate(
                [y_b16, jnp.zeros((c8 - c, LBp), jnp.bfloat16)], axis=0)
        # zero halo in VMEM (no wrapper-side jnp.pad / extra HBM traffic)
        halo = jnp.zeros((c8, halo_w), jnp.bfloat16)
        yp = jnp.concatenate([halo, y_b16, halo], axis=1)
        # merged (3 ConvTranspose1d branches + folded 1x1 bottleneck) as ONE
        # im2col matmul, bf16 operands / f32 accumulation on the MXU
        cols = jnp.concatenate(
            [yp[:, s * B: s * B + LBp] for s in range(NUM_SHIFTS)], axis=0)
        bneck = jnp.dot(wm, cols, preferred_element_type=jnp.float32)
        z = jnp.maximum(batchnorm(bneck + unpool(z4, tgt), gamma, beta), 0.0)
        # zero dead lanes so the next stage's conv halo / unpool see true zeros
        return jnp.where(valid, z, 0.0)

    x = x_ref[...]                            # (c_in, LBp) bf16
    c_in = x.shape[0]
    c_in8 = _round8(c_in)

    # inception_1's conv_to_maxpool (out_channels = c_in) fused with the
    # residual 1x1 ConvTranspose: one K=c_in dot instead of two.
    zr = jnp.dot(wmpr1_ref[...], x, preferred_element_type=jnp.float32)
    z4_1 = zr[:c_in, :]
    res = zr[c_in8:, :] + rb_ref[...]

    # Three stacked InceptionTranspose modules (indices[2], [1], [0]).
    z = inception(x, t1_ref[...], wm1_ref[...], z4_1, g1_ref[...], b1_ref[...])
    zb = z.astype(jnp.bfloat16)
    z4_2 = jnp.dot(wmp2_ref[...], zb, preferred_element_type=jnp.float32)
    z = inception(zb, t2_ref[...], wm2_ref[...], z4_2, g2_ref[...], b2_ref[...])
    zb = z.astype(jnp.bfloat16)
    z4_3 = jnp.dot(wmp3_ref[...], zb, preferred_element_type=jnp.float32)
    z = inception(zb, t3_ref[...], wm3_ref[...], z4_3, g3_ref[...], b3_ref[...])

    # Residual BatchNorm1d, add, final ReLU.
    res_bn = batchnorm(res, rg_ref[...], rbeta_ref[...])
    out_ref[...] = jnp.maximum(z + res_bn, 0.0)


def _vmem_specs(n):
    return [pl.BlockSpec(memory_space=pltpu.MemorySpace.VMEM)] * n


# ------------------------------- wrapper -------------------------------------

def inception_transpose_block(x, indices, params):
    """x: (B, C_in, L); indices: list of 3 int arrays (B, C, L); -> (B, C_out, L)."""
    B, c_in, L = x.shape
    c_out = params['res_gamma'].shape[0]
    LB = L * B
    LBp = -(-LB // 128) * 128                 # lane-dense output / matmul N dim
    lane_pad = LBp - LB

    # Layout plumbing: channel-major, batch interleaved into the lane axis
    # (column = l*B + b), zero-padded to a 128 multiple, cast to bf16 once.
    # TODO(synk): in production, produce/consume this layout in adjacent ops
    # instead of paying two full HBM reorders here.
    x_i = jnp.transpose(x, (1, 2, 0)).reshape(c_in, LB).astype(jnp.bfloat16)
    x_i = jnp.pad(x_i, ((0, 0), (0, lane_pad)))

    def make_tgt(idx):
        # Destination column of the unpool scatter for source column l*B + b.
        b_off = jnp.arange(B, dtype=jnp.int32)[:, None, None]
        t = idx.astype(jnp.int32) * B + b_off                  # (B, C, L)
        t = jnp.transpose(t, (1, 2, 0)).reshape(idx.shape[1], LB)
        return jnp.pad(t, ((0, 0), (0, lane_pad)), constant_values=-1)

    t1 = make_tgt(indices[2])   # inception_1 (out_channels = C_in)
    t2 = make_tgt(indices[1])   # inception_2 (out_channels = C_in)
    t3 = make_tgt(indices[0])   # inception_3 (out_channels = C_out)

    p1, p2, p3 = params['inc1'], params['inc2'], params['inc3']
    # Stack inception-1's conv_to_maxpool with the residual 1x1 weight
    # (sublane-aligned split point inside the kernel).
    pad_rows = _round8(c_in) - c_in
    parts = [p1['wmp']]
    if pad_rows:
        parts.append(jnp.zeros((pad_rows, c_in), jnp.bfloat16))
    parts.append(params['res_w'])
    wmpr1 = jnp.concatenate(parts, axis=0)

    kern = functools.partial(_block_kernel, B=B, LB=LB)
    out_i = pl.pallas_call(
        kern,
        out_shape=jax.ShapeDtypeStruct((c_out, LBp), jnp.float32),
        in_specs=_vmem_specs(19),
        out_specs=pl.BlockSpec(memory_space=pltpu.MemorySpace.VMEM),
        # TODO(synk): once tiled for long L, set vmem_limit_bytes explicitly
        # (v7x: 64 MiB physical / 32 MiB default scoped) and mark the lane
        # grid axis "parallel" for dual-TC v7x.
    )(x_i, t1, t2, t3,
      p1['wm'], wmpr1, p1['gamma'], p1['beta'],
      p2['wm'], p2['wmp'], p2['gamma'], p2['beta'],
      p3['wm'], p3['wmp'], p3['gamma'], p3['beta'],
      params['res_b'], params['res_gamma'], params['res_beta'])

    # Back to PyTorch (N, C, L) layout (drop dead lanes).
    return jnp.transpose(out_i[:, :LB].reshape(c_out, L, B), (2, 0, 1))


# ---------------- deterministic parameter construction (glue) ----------------

def _init_inception(key, c_in, c_out, bneck):
    c8 = _round8(c_in)
    ks = jax.random.split(key, 5)
    # PyTorch params: 3 ConvTranspose1d weights (c_in, bneck, k), bottleneck
    # 1x1 (c_out, 3*bneck), conv_to_maxpool (c_out, c_in).
    wb = 0.2 * jax.random.normal(ks[4], (c_out, 3 * bneck), jnp.float32)
    # Fold the 1x1 bottleneck into the branch taps (linear ops commute):
    # merged weight indexed by effective shift s = MAX_PAD - pad + j, with the
    # per-shift channel block zero-padded to 8 sublanes.
    wm = jnp.zeros((c_out, NUM_SHIFTS, c8), jnp.float32)
    for br, k in enumerate(KERNEL_SIZES):
        pad = k // 2
        w = 0.2 * jax.random.normal(ks[br], (c_in, bneck, k), jnp.float32)
        w_flip = w[:, :, ::-1]     # transposed conv == "same" xcorr w/ flipped taps
        contrib = jnp.einsum('om,cmj->ojc',
                             wb[:, br * bneck:(br + 1) * bneck], w_flip)
        wm = wm.at[:, MAX_PAD - pad: MAX_PAD - pad + k, :c_in].add(contrib)
    return {
        'wm': wm.reshape(c_out, NUM_SHIFTS * c8).astype(jnp.bfloat16),
        'wmp': (0.2 * jax.random.normal(ks[3], (c_out, c_in), jnp.float32)
                ).astype(jnp.bfloat16),
        'gamma': jnp.ones((c_out, 1), jnp.float32),     # BN affine defaults
        'beta': jnp.zeros((c_out, 1), jnp.float32),
    }


def _init_block(key, c_in, c_out, bneck):
    k1, k2, k3, k4, k5 = jax.random.split(key, 5)
    wr = 0.2 * jax.random.normal(k4, (c_in, c_out, 1), jnp.float32)  # ConvT k=1
    return {
        'inc1': _init_inception(k1, c_in, c_in, bneck),
        'inc2': _init_inception(k2, c_in, c_in, bneck),
        'inc3': _init_inception(k3, c_in, c_out, bneck),
        'res_w': jnp.transpose(wr[:, :, 0], (1, 0)).astype(jnp.bfloat16),
        'res_b': 0.1 * jax.random.normal(k5, (c_out, 1), jnp.float32),
        'res_gamma': jnp.ones((c_out, 1), jnp.float32),
        'res_beta': jnp.zeros((c_out, 1), jnp.float32),
    }


# --------------------- pure-JAX reference (same math) ------------------------

def _reference_forward(x, indices, params):
    """Mirror of the kernel math (folded bf16 weights, sum-on-collision unpool,
    biased training-mode BN) in plain JAX, PyTorch (N, C, L) layout."""
    _, _, L = x.shape
    f32 = jnp.float32

    def bn(t, gamma, beta):
        mean = jnp.mean(t, axis=(0, 2), keepdims=True)
        var = jnp.maximum(jnp.mean(t * t, axis=(0, 2), keepdims=True)
                          - mean * mean, 0.0)
        g = gamma[:, 0][None, :, None]
        b = beta[:, 0][None, :, None]
        return (t - mean) * lax.rsqrt(var + BN_EPS) * g + b

    def unpool(z4, idx):
        onehot = (idx[..., None] == jnp.arange(L)[None, None, None, :]).astype(f32)
        return jnp.einsum('bcl,bclt->bct', z4, onehot)

    def inception(y, idx, p):
        c = y.shape[1]
        c8 = _round8(c)
        yb = y.astype(jnp.bfloat16)
        wm = p['wm'].reshape(-1, NUM_SHIFTS, c8)[:, :, :c]
        yp = jnp.pad(yb, ((0, 0), (0, 0), (MAX_PAD, MAX_PAD)))
        cols = jnp.stack([yp[:, :, s:s + L] for s in range(NUM_SHIFTS)], axis=1)
        bneck = jnp.einsum('osc,bscl->bol', wm, cols, preferred_element_type=f32)
        z4 = jnp.einsum('oc,bcl->bol', p['wmp'], yb, preferred_element_type=f32)
        return jnp.maximum(bn(bneck + unpool(z4, idx), p['gamma'], p['beta']), 0.0)

    z = inception(x, indices[2], params['inc1'])
    z = inception(z, indices[1], params['inc2'])
    z = inception(z, indices[0], params['inc3'])
    xb = x.astype(jnp.bfloat16)
    r = jnp.einsum('oc,bcl->bol', params['res_w'], xb, preferred_element_type=f32)
    r = r + params['res_b'][:, 0][None, :, None]
    r = bn(r, params['res_gamma'], params['res_beta'])
    return jnp.maximum(z + r, 0.0)


def _maxpool1d_indices(key, b, c, l):
    """Genuine MaxPool1d(kernel=3, stride=1, padding=1) return_indices, so every
    unpool target satisfies |tgt - src| <= 1 (the kernel's scatter window)."""
    u = jax.random.normal(key, (b, c, l), jnp.float32)
    up = jnp.pad(u, ((0, 0), (0, 0), (1, 1)), constant_values=-jnp.inf)
    win = jnp.stack([up[..., j:j + l] for j in range(3)], axis=-1)
    arg = jnp.argmax(win, axis=-1).astype(jnp.int32)
    return jnp.arange(l, dtype=jnp.int32) - 1 + arg


if __name__ == "__main__":
    B, C_IN, C_OUT, BNECK, L = 2, 4, 8, 8, 24      # LB=48 -> padded to 128 lanes

    root = jax.random.PRNGKey(0)
    kx, kp, ki = jax.random.split(root, 3)

    x = jax.random.normal(kx, (B, C_IN, L), jnp.float32)
    params = _init_block(kp, C_IN, C_OUT, BNECK)

    k0, k1, k2 = jax.random.split(ki, 3)
    indices = [_maxpool1d_indices(k0, B, C_OUT, L),   # used by inception_3
               _maxpool1d_indices(k1, B, C_IN, L),    # used by inception_2
               _maxpool1d_indices(k2, B, C_IN, L)]    # used by inception_1

    out = jax.jit(inception_transpose_block)(x, indices, params)
    out = jax.block_until_ready(out)
    assert out.shape == (B, C_OUT, L) and out.dtype == jnp.float32
    assert bool(jnp.all(jnp.isfinite(out)))

    ref = _reference_forward(x, indices, params)
    max_err = float(jnp.max(jnp.abs(out - ref)))
    assert bool(jnp.allclose(out, ref, rtol=2e-2, atol=2e-2)), max_err

    print("KERNEL_OK")
</pallas_src>

<mosaic_0001>
module attributes {stable_mosaic.version = 11 : i64} {
  func.func @_block_kernel(%arg0: memref<4x128xbf16, #tpu.memory_space<vmem>>, %arg1: memref<4x128xi32, #tpu.memory_space<vmem>>, %arg2: memref<4x128xi32, #tpu.memory_space<vmem>>, %arg3: memref<8x128xi32, #tpu.memory_space<vmem>>, %arg4: memref<4x312xbf16, #tpu.memory_space<vmem>>, %arg5: memref<16x4xbf16, #tpu.memory_space<vmem>>, %arg6: memref<4x1xf32, #tpu.memory_space<vmem>>, %arg7: memref<4x1xf32, #tpu.memory_space<vmem>>, %arg8: memref<4x312xbf16, #tpu.memory_space<vmem>>, %arg9: memref<4x4xbf16, #tpu.memory_space<vmem>>, %arg10: memref<4x1xf32, #tpu.memory_space<vmem>>, %arg11: memref<4x1xf32, #tpu.memory_space<vmem>>, %arg12: memref<8x312xbf16, #tpu.memory_space<vmem>>, %arg13: memref<8x4xbf16, #tpu.memory_space<vmem>>, %arg14: memref<8x1xf32, #tpu.memory_space<vmem>>, %arg15: memref<8x1xf32, #tpu.memory_space<vmem>>, %arg16: memref<8x1xf32, #tpu.memory_space<vmem>>, %arg17: memref<8x1xf32, #tpu.memory_space<vmem>>, %arg18: memref<8x1xf32, #tpu.memory_space<vmem>>, %arg19: memref<8x128xf32, #tpu.memory_space<vmem>>) attributes {dimension_semantics = [], scalar_prefetch = 0 : i64, scratch_operands = 0 : i64, tpu.core_type = #tpu.core_type<tc>} {
    %0 = tpu.iota {dimensions = array<i32: 1>} : vector<1x128xi32>
    %c48_i32 = arith.constant 48 : i32
    %1 = vector.broadcast %c48_i32 : i32 to vector<1x128xi32>
    %2 = arith.cmpi slt, %0, %1 : vector<1x128xi32>
    %c0 = arith.constant 0 : index
    %c0_0 = arith.constant 0 : index
    %3 = vector.load %arg0[%c0, %c0_0] : memref<4x128xbf16, #tpu.memory_space<vmem>>, vector<4x128xbf16>
    %c0_1 = arith.constant 0 : index
    %c0_2 = arith.constant 0 : index
    %4 = vector.load %arg5[%c0_1, %c0_2] : memref<16x4xbf16, #tpu.memory_space<vmem>>, vector<16x4xbf16>
    %cst = arith.constant dense<0.000000e+00> : vector<16x128xf32>
    %5 = tpu.matmul %4, %3, %cst {dimension_numbers = #tpu.dot_dimension_numbers<[1], [0], [0], [1], [0, 0, 1, 1], [], []>} : vector<16x4xbf16>, vector<4x128xbf16>, vector<16x128xf32> -> vector<16x128xf32>
    %6 = vector.extract_strided_slice %5 {offsets = [0, 0], sizes = [4, 128], strides = [1, 1]} : vector<16x128xf32> to vector<4x128xf32>
    %7 = vector.extract_strided_slice %5 {offsets = [8, 0], sizes = [8, 128], strides = [1, 1]} : vector<16x128xf32> to vector<8x128xf32>
    %c0_3 = arith.constant 0 : index
    %c0_4 = arith.constant 0 : index
    %8 = vector.load %arg16[%c0_3, %c0_4] : memref<8x1xf32, #tpu.memory_space<vmem>>, vector<8x1xf32>
    %9 = vector.broadcast %8 : vector<8x1xf32> to vector<8x128xf32>
    %10 = arith.addf %7, %9 : vector<8x128xf32>
    %c0_5 = arith.constant 0 : index
    %c0_6 = arith.constant 0 : index
    %11 = vector.load %arg1[%c0_5, %c0_6] : memref<4x128xi32, #tpu.memory_space<vmem>>, vector<4x128xi32>
    %c0_7 = arith.constant 0 : index
    %c0_8 = arith.constant 0 : index
    %12 = vector.load %arg4[%c0_7, %c0_8] : memref<4x312xbf16, #tpu.memory_space<vmem>>, vector<4x312xbf16>
    %c0_9 = arith.constant 0 : index
    %c0_10 = arith.constant 0 : index
    %13 = vector.load %arg6[%c0_9, %c0_10] : memref<4x1xf32, #tpu.memory_space<vmem>>, vector<4x1xf32>
    %c0_11 = arith.constant 0 : index
    %c0_12 = arith.constant 0 : index
    %14 = vector.load %arg7[%c0_11, %c0_12] : memref<4x1xf32, #tpu.memory_space<vmem>>, vector<4x1xf32>
    %cst_13 = arith.constant 0.000000e+00 : bf16
    %15 = vector.broadcast %cst_13 : bf16 to vector<4x128xbf16>
    %16 = tpu.concatenate %3, %15 in 0 : vector<4x128xbf16>, vector<4x128xbf16> -> vector<8x128xbf16>
    %cst_14 = arith.constant 0.000000e+00 : bf16
    %17 = vector.broadcast %cst_14 : bf16 to vector<8x38xbf16>
    %18 = tpu.concatenate %17, %16, %17 in 1 : vector<8x38xbf16>, vector<8x128xbf16>, vector<8x38xbf16> -> vector<8x204xbf16>
    %19 = vector.extract_strided_slice %18 {offsets = [0, 0], sizes = [8, 128], strides = [1, 1]} : vector<8x204xbf16> to vector<8x128xbf16>
    %20 = vector.extract_strided_slice %18 {offsets = [0, 2], sizes = [8, 128], strides = [1, 1]} : vector<8x204xbf16> to vector<8x128xbf16>
    %21 = vector.extract_strided_slice %18 {offsets = [0, 4], sizes = [8, 128], strides = [1, 1]} : vector<8x204xbf16> to vector<8x128xbf16>
    %22 = vector.extract_strided_slice %18 {offsets = [0, 6], sizes = [8, 128], strides = [1, 1]} : vector<8x204xbf16> to vector<8x128xbf16>
    %23 = vector.extract_strided_slice %18 {offsets = [0, 8], sizes = [8, 128], strides = [1, 1]} : vector<8x204xbf16> to vector<8x128xbf16>
    %24 = vector.extract_strided_slice %18 {offsets = [0, 10], sizes = [8, 128], strides = [1, 1]} : vector<8x204xbf16> to vector<8x128xbf16>
    %25 = vector.extract_strided_slice %18 {offsets = [0, 12], sizes = [8, 128], strides = [1, 1]} : vector<8x204xbf16> to vector<8x128xbf16>
    %26 = vector.extract_strided_slice %18 {offsets = [0, 14], sizes = [8, 128], strides = [1, 1]} : vector<8x204xbf16> to vector<8x128xbf16>
    %27 = vector.extract_strided_slice %18 {offsets = [0, 16], sizes = [8, 128], strides = [1, 1]} : vector<8x204xbf16> to vector<8x128xbf16>
    %28 = vector.extract_strided_slice %18 {offsets = [0, 18], sizes = [8, 128], strides = [1, 1]} : vector<8x204xbf16> to vector<8x128xbf16>
    %29 = vector.extract_strided_slice %18 {offsets = [0, 20], sizes = [8, 128], strides = [1, 1]} : vector<8x204xbf16> to vector<8x128xbf16>
    %30 = vector.extract_strided_slice %18 {offsets = [0, 22], sizes = [8, 128], strides = [1, 1]} : vector<8x204xbf16> to vector<8x128xbf16>
    %31 = vector.extract_strided_slice %18 {offsets = [0, 24], sizes = [8, 128], strides = [1, 1]} : vector<8x204xbf16> to vector<8x128xbf16>
    %32 = vector.extract_strided_slice %18 {offsets = [0, 26], sizes = [8, 128], strides = [1, 1]} : vector<8x204xbf16> to vector<8x128xbf16>
    %33 = vector.extract_strided_slice %18 {offsets = [0, 28], sizes = [8, 128], strides = [1, 1]} : vector<8x204xbf16> to vector<8x128xbf16>
    %34 = vector.extract_strided_slice %18 {offsets = [0, 30], sizes = [8, 128], strides = [1, 1]} : vector<8x204xbf16> to vector<8x128xbf16>
    %35 = vector.extract_strided_slice %18 {offsets = [0, 32], sizes = [8, 128], strides = [1, 1]} : vector<8x204xbf16> to vector<8x128xbf16>
    %36 = vector.extract_strided_slice %18 {offsets = [0, 34], sizes = [8, 128], strides = [1, 1]} : vector<8x204xbf16> to vector<8x128xbf16>
    %37 = vector.extract_strided_slice %18 {offsets = [0, 36], sizes = [8, 128], strides = [1, 1]} : vector<8x204xbf16> to vector<8x128xbf16>
    %38 = vector.extract_strided_slice %18 {offsets = [0, 38], sizes = [8, 128], strides = [1, 1]} : vector<8x204xbf16> to vector<8x128xbf16>
    %39 = vector.extract_strided_slice %18 {offsets = [0, 40], sizes = [8, 128], strides = [1, 1]} : vector<8x204xbf16> to vector<8x128xbf16>
    %40 = vector.extract_strided_slice %18 {offsets = [0, 42], sizes = [8, 128], strides = [1, 1]} : vector<8x204xbf16> to vector<8x128xbf16>
    %41 = vector.extract_strided_slice %18 {offsets = [0, 44], sizes = [8, 128], strides = [1, 1]} : vector<8x204xbf16> to vector<8x128xbf16>
    %42 = vector.extract_strided_slice %18 {offsets = [0, 46], sizes = [8, 128], strides = [1, 1]} : vector<8x204xbf16> to vector<8x128xbf16>
    %43 = vector.extract_strided_slice %18 {offsets = [0, 48], sizes = [8, 128], strides = [1, 1]} : vector<8x204xbf16> to vector<8x128xbf16>
    %44 = vector.extract_strided_slice %18 {offsets = [0, 50], sizes = [8, 128], strides = [1, 1]} : vector<8x204xbf16> to vector<8x128xbf16>
    %45 = vector.extract_strided_slice %18 {offsets = [0, 52], sizes = [8, 128], strides = [1, 1]} : vector<8x204xbf16> to vector<8x128xbf16>
    %46 = vector.extract_strided_slice %18 {offsets = [0, 54], sizes = [8, 128], strides = [1, 1]} : vector<8x204xbf16> to vector<8x128xbf16>
    %47 = vector.extract_strided_slice %18 {offsets = [0, 56], sizes = [8, 128], strides = [1, 1]} : vector<8x204xbf16> to vector<8x128xbf16>
    %48 = vector.extract_strided_slice %18 {offsets = [0, 58], sizes = [8, 128], strides = [1, 1]} : vector<8x204xbf16> to vector<8x128xbf16>
    %49 = vector.extract_strided_slice %18 {offsets = [0, 60], sizes = [8, 128], strides = [1, 1]} : vector<8x204xbf16> to vector<8x128xbf16>
    %50 = vector.extract_strided_slice %18 {offsets = [0, 62], sizes = [8, 128], strides = [1, 1]} : vector<8x204xbf16> to vector<8x128xbf16>
    %51 = vector.extract_strided_slice %18 {offsets = [0, 64], sizes = [8, 128], strides = [1, 1]} : vector<8x204xbf16> to vector<8x128xbf16>
    %52 = vector.extract_strided_slice %18 {offsets = [0, 66], sizes = [8, 128], strides = [1, 1]} : vector<8x204xbf16> to vector<8x128xbf16>
    %53 = vector.extract_strided_slice %18 {offsets = [0, 68], sizes = [8, 128], strides = [1, 1]} : vector<8x204xbf16> to vector<8x128xbf16>
    %54 = vector.extract_strided_slice %18 {offsets = [0, 70], sizes = [8, 128], strides = [1, 1]} : vector<8x204xbf16> to vector<8x128xbf16>
    %55 = vector.extract_strided_slice %18 {offsets = [0, 72], sizes = [8, 128], strides = [1, 1]} : vector<8x204xbf16> to vector<8x128xbf16>
    %56 = vector.extract_strided_slice %18 {offsets = [0, 74], sizes = [8, 128], strides = [1, 1]} : vector<8x204xbf16> to vector<8x128xbf16>
    %57 = vector.extract_strided_slice %18 {offsets = [0, 76], sizes = [8, 128], strides = [1, 1]} : vector<8x204xbf16> to vector<8x128xbf16>
    %58 = tpu.concatenate %19, %20, %21, %22, %23, %24, %25, %26, %27, %28, %29, %30, %31, %32, %33, %34 in 0 : vector<8x128xbf16>, vector<8x128xbf16>, vector<8x128xbf16>, vector<8x128xbf16>, vector<8x128xbf16>, vector<8x128xbf16>, vector<8x128xbf16>, vector<8x128xbf16>, vector<8x128xbf16>, vector<8x128xbf16>, vector<8x128xbf16>, vector<8x128xbf16>, vector<8x128xbf16>, vector<8x128xbf16>, vector<8x128xbf16>, vector<8x128xbf16> -> vector<128x128xbf16>
    %59 = tpu.concatenate %35, %36, %37, %38, %39, %40, %41, %42, %43, %44, %45, %46, %47, %48, %49, %50 in 0 : vector<8x128xbf16>, vector<8x128xbf16>, vector<8x128xbf16>, vector<8x128xbf16>, vector<8x128xbf16>, vector<8x128xbf16>, vector<8x128xbf16>, vector<8x128xbf16>, vector<8x128xbf16>, vector<8x128xbf16>, vector<8x128xbf16>, vector<8x128xbf16>, vector<8x128xbf16>, vector<8x128xbf16>, vector<8x128xbf16>, vector<8x128xbf16> -> vector<128x128xbf16>
    %60 = tpu.concatenate %51, %52, %53, %54, %55, %56, %57 in 0 : vector<8x128xbf16>, vector<8x128xbf16>, vector<8x128xbf16>, vector<8x128xbf16>, vector<8x128xbf16>, vector<8x128xbf16>, vector<8x128xbf16> -> vector<56x128xbf16>
    %61 = tpu.concatenate %58, %59, %60 in 0 : vector<128x128xbf16>, vector<128x128xbf16>, vector<56x128xbf16> -> vector<312x128xbf16>
    %cst_15 = arith.constant dense<0.000000e+00> : vector<4x128xf32>
    %62 = tpu.matmul %12, %61, %cst_15 {dimension_numbers = #tpu.dot_dimension_numbers<[1], [0], [0], [1], [0, 0, 1, 1], [], []>} : vector<4x312xbf16>, vector<312x128xbf16>, vector<4x128xf32> -> vector<4x128xf32>
    %63 = vector.broadcast %0 : vector<1x128xi32> to vector<4x128xi32>
    %64 = arith.cmpi eq, %11, %63 : vector<4x128xi32>
    %cst_16 = arith.constant 0.000000e+00 : f32
    %65 = vector.broadcast %cst_16 : f32 to vector<4x128xf32>
    %66 = arith.select %64, %6, %65 : vector<4x128xi1>, vector<4x128xf32>
    %c2_i32 = arith.constant 2 : i32
    %67 = vector.broadcast %c2_i32 : i32 to vector<1x128xi32>
    %68 = arith.addi %0, %67 : vector<1x128xi32>
    %69 = vector.broadcast %68 : vector<1x128xi32> to vector<4x128xi32>
    %70 = arith.cmpi eq, %11, %69 : vector<4x128xi32>
    %cst_17 = arith.constant 0.000000e+00 : f32
    %71 = vector.broadcast %cst_17 : f32 to vector<4x128xf32>
    %72 = arith.select %70, %6, %71 : vector<4x128xi1>, vector<4x128xf32>
    %c2_i32_18 = arith.constant 2 : i32
    %73 = tpu.dynamic_rotate %72 by %c2_i32_18 dim 1 : vector<4x128xf32>, i32 -> vector<4x128xf32>
    %74 = arith.addf %66, %73 : vector<4x128xf32>
    %c-2_i32 = arith.constant -2 : i32
    %75 = vector.broadcast %c-2_i32 : i32 to vector<1x128xi32>
    %76 = arith.addi %0, %75 : vector<1x128xi32>
    %77 = vector.broadcast %76 : vector<1x128xi32> to vector<4x128xi32>
    %78 = arith.cmpi eq, %11, %77 : vector<4x128xi32>
    %cst_19 = arith.constant 0.000000e+00 : f32
    %79 = vector.broadcast %cst_19 : f32 to vector<4x128xf32>
    %80 = arith.select %78, %6, %79 : vector<4x128xi1>, vector<4x128xf32>
    %c126_i32 = arith.constant 126 : i32
    %81 = tpu.dynamic_rotate %80 by %c126_i32 dim 1 : vector<4x128xf32>, i32 -> vector<4x128xf32>
    %82 = arith.addf %74, %81 : vector<4x128xf32>
    %83 = arith.addf %62, %82 : vector<4x128xf32>
    %cst_20 = arith.constant 0.000000e+00 : f32
    %84 = vector.shape_cast %2 : vector<1x128xi1> to vector<1x128xi1>
    %85 = vector.broadcast %84 : vector<1x128xi1> to vector<4x128xi1>
    %86 = vector.broadcast %cst_20 : f32 to vector<4x128xf32>
    %87 = arith.select %85, %83, %86 : vector<4x128xi1>, vector<4x128xf32>
    %cst_21 = arith.constant dense<0.000000e+00> : vector<4xf32>
    %88 = vector.multi_reduction <add>, %87, %cst_21 [1] : vector<4x128xf32> to vector<4xf32>
    %89 = vector.shape_cast %88 : vector<4xf32> to vector<4x1xf32>
    %cst_22 = arith.constant 0.020833334 : f32
    %90 = vector.broadcast %cst_22 : f32 to vector<4x1xf32>
    %91 = arith.mulf %89, %90 : vector<4x1xf32>
    %92 = arith.mulf %87, %87 : vector<4x128xf32>
    %cst_23 = arith.constant dense<0.000000e+00> : vector<4xf32>
    %93 = vector.multi_reduction <add>, %92, %cst_23 [1] : vector<4x128xf32> to vector<4xf32>
    %94 = vector.shape_cast %93 : vector<4xf32> to vector<4x1xf32>
    %cst_24 = arith.constant 0.020833334 : f32
    %95 = vector.broadcast %cst_24 : f32 to vector<4x1xf32>
    %96 = arith.mulf %94, %95 : vector<4x1xf32>
    %97 = arith.mulf %91, %91 : vector<4x1xf32>
    %98 = arith.subf %96, %97 : vector<4x1xf32>
    %cst_25 = arith.constant 0.000000e+00 : f32
    %99 = vector.broadcast %cst_25 : f32 to vector<4x1xf32>
    %100 = arith.maximumf %98, %99 : vector<4x1xf32>
    %101 = vector.broadcast %91 : vector<4x1xf32> to vector<4x128xf32>
    %102 = arith.subf %83, %101 : vector<4x128xf32>
    %cst_26 = arith.constant 9.99999974E-6 : f32
    %103 = vector.broadcast %cst_26 : f32 to vector<4x1xf32>
    %104 = arith.addf %100, %103 : vector<4x1xf32>
    %105 = math.rsqrt %104 : vector<4x1xf32>
    %106 = vector.broadcast %105 : vector<4x1xf32> to vector<4x128xf32>
    %107 = arith.mulf %102, %106 : vector<4x128xf32>
    %108 = vector.broadcast %13 : vector<4x1xf32> to vector<4x128xf32>
    %109 = arith.mulf %107, %108 : vector<4x128xf32>
    %110 = vector.broadcast %14 : vector<4x1xf32> to vector<4x128xf32>
    %111 = arith.addf %109, %110 : vector<4x128xf32>
    %cst_27 = arith.constant 0.000000e+00 : f32
    %112 = vector.broadcast %cst_27 : f32 to vector<4x128xf32>
    %113 = arith.maximumf %111, %112 : vector<4x128xf32>
    %cst_28 = arith.constant 0.000000e+00 : f32
    %114 = vector.shape_cast %2 : vector<1x128xi1> to vector<1x128xi1>
    %115 = vector.broadcast %114 : vector<1x128xi1> to vector<4x128xi1>
    %116 = vector.broadcast %cst_28 : f32 to vector<4x128xf32>
    %117 = arith.select %115, %113, %116 : vector<4x128xi1>, vector<4x128xf32>
    %118 = arith.truncf %117 : vector<4x128xf32> to vector<4x128xbf16>
    %c0_29 = arith.constant 0 : index
    %c0_30 = arith.constant 0 : index
    %119 = vector.load %arg9[%c0_29, %c0_30] : memref<4x4xbf16, #tpu.memory_space<vmem>>, vector<4x4xbf16>
    %cst_31 = arith.constant dense<0.000000e+00> : vector<4x128xf32>
    %120 = tpu.matmul %119, %118, %cst_31 {dimension_numbers = #tpu.dot_dimension_numbers<[1], [0], [0], [1], [0, 0, 1, 1], [], []>} : vector<4x4xbf16>, vector<4x128xbf16>, vector<4x128xf32> -> vector<4x128xf32>
    %c0_32 = arith.constant 0 : index
    %c0_33 = arith.constant 0 : index
    %121 = vector.load %arg2[%c0_32, %c0_33] : memref<4x128xi32, #tpu.memory_space<vmem>>, vector<4x128xi32>
    %c0_34 = arith.constant 0 : index
    %c0_35 = arith.constant 0 : index
    %122 = vector.load %arg8[%c0_34, %c0_35] : memref<4x312xbf16, #tpu.memory_space<vmem>>, vector<4x312xbf16>
    %c0_36 = arith.constant 0 : index
    %c0_37 = arith.constant 0 : index
    %123 = vector.load %arg10[%c0_36, %c0_37] : memref<4x1xf32, #tpu.memory_space<vmem>>, vector<4x1xf32>
    %c0_38 = arith.constant 0 : index
    %c0_39 = arith.constant 0 : index
    %124 = vector.load %arg11[%c0_38, %c0_39] : memref<4x1xf32, #tpu.memory_space<vmem>>, vector<4x1xf32>
    %cst_40 = arith.constant 0.000000e+00 : bf16
    %125 = vector.broadcast %cst_40 : bf16 to vector<4x128xbf16>
    %126 = tpu.concatenate %118, %125 in 0 : vector<4x128xbf16>, vector<4x128xbf16> -> vector<8x128xbf16>
    %cst_41 = arith.constant 0.000000e+00 : bf16
    %127 = vector.broadcast %cst_41 : bf16 to vector<8x38xbf16>
    %128 = tpu.concatenate %127, %126, %127 in 1 : vector<8x38xbf16>, vector<8x128xbf16>, vector<8x38xbf16> -> vector<8x204xbf16>
    %129 = vector.extract_strided_slice %128 {offsets = [0, 0], sizes = [8, 128], strides = [1, 1]} : vector<8x204xbf16> to vector<8x128xbf16>
    %130 = vector.extract_strided_slice %128 {offsets = [0, 2], sizes = [8, 128], strides = [1, 1]} : vector<8x204xbf16> to vector<8x128xbf16>
    %131 = vector.extract_strided_slice %128 {offsets = [0, 4], sizes = [8, 128], strides = [1, 1]} : vector<8x204xbf16> to vector<8x128xbf16>
    %132 = vector.extract_strided_slice %128 {offsets = [0, 6], sizes = [8, 128], strides = [1, 1]} : vector<8x204xbf16> to vector<8x128xbf16>
    %133 = vector.extract_strided_slice %128 {offsets = [0, 8], sizes = [8, 128], strides = [1, 1]} : vector<8x204xbf16> to vector<8x128xbf16>
    %134 = vector.extract_strided_slice %128 {offsets = [0, 10], sizes = [8, 128], strides = [1, 1]} : vector<8x204xbf16> to vector<8x128xbf16>
    %135 = vector.extract_strided_slice %128 {offsets = [0, 12], sizes = [8, 128], strides = [1, 1]} : vector<8x204xbf16> to vector<8x128xbf16>
    %136 = vector.extract_strided_slice %128 {offsets = [0, 14], sizes = [8, 128], strides = [1, 1]} : vector<8x204xbf16> to vector<8x128xbf16>
    %137 = vector.extract_strided_slice %128 {offsets = [0, 16], sizes = [8, 128], strides = [1, 1]} : vector<8x204xbf16> to vector<8x128xbf16>
    %138 = vector.extract_strided_slice %128 {offsets = [0, 18], sizes = [8, 128], strides = [1, 1]} : vector<8x204xbf16> to vector<8x128xbf16>
    %139 = vector.extract_strided_slice %128 {offsets = [0, 20], sizes = [8, 128], strides = [1, 1]} : vector<8x204xbf16> to vector<8x128xbf16>
    %140 = vector.extract_strided_slice %128 {offsets = [0, 22], sizes = [8, 128], strides = [1, 1]} : vector<8x204xbf16> to vector<8x128xbf16>
    %141 = vector.extract_strided_slice %128 {offsets = [0, 24], sizes = [8, 128], strides = [1, 1]} : vector<8x204xbf16> to vector<8x128xbf16>
    %142 = vector.extract_strided_slice %128 {offsets = [0, 26], sizes = [8, 128], strides = [1, 1]} : vector<8x204xbf16> to vector<8x128xbf16>
    %143 = vector.extract_strided_slice %128 {offsets = [0, 28], sizes = [8, 128], strides = [1, 1]} : vector<8x204xbf16> to vector<8x128xbf16>
    %144 = vector.extract_strided_slice %128 {offsets = [0, 30], sizes = [8, 128], strides = [1, 1]} : vector<8x204xbf16> to vector<8x128xbf16>
    %145 = vector.extract_strided_slice %128 {offsets = [0, 32], sizes = [8, 128], strides = [1, 1]} : vector<8x204xbf16> to vector<8x128xbf16>
    %146 = vector.extract_strided_slice %128 {offsets = [0, 34], sizes = [8, 128], strides = [1, 1]} : vector<8x204xbf16> to vector<8x128xbf16>
    %147 = vector.extract_strided_slice %128 {offsets = [0, 36], sizes = [8, 128], strides = [1, 1]} : vector<8x204xbf16> to vector<8x128xbf16>
    %148 = vector.extract_strided_slice %128 {offsets = [0, 38], sizes = [8, 128], strides = [1, 1]} : vector<8x204xbf16> to vector<8x128xbf16>
    %149 = vector.extract_strided_slice %128 {offsets = [0, 40], sizes = [8, 128], strides = [1, 1]} : vector<8x204xbf16> to vector<8x128xbf16>
    %150 = vector.extract_strided_slice %128 {offsets = [0, 42], sizes = [8, 128], strides = [1, 1]} : vector<8x204xbf16> to vector<8x128xbf16>
    %151 = vector.extract_strided_slice %128 {offsets = [0, 44], sizes = [8, 128], strides = [1, 1]} : vector<8x204xbf16> to vector<8x128xbf16>
    %152 = vector.extract_strided_slice %128 {offsets = [0, 46], sizes = [8, 128], strides = [1, 1]} : vector<8x204xbf16> to vector<8x128xbf16>
    %153 = vector.extract_strided_slice %128 {offsets = [0, 48], sizes = [8, 128], strides = [1, 1]} : vector<8x204xbf16> to vector<8x128xbf16>
    %154 = vector.extract_strided_slice %128 {offsets = [0, 50], sizes = [8, 128], strides = [1, 1]} : vector<8x204xbf16> to vector<8x128xbf16>
    %155 = vector.extract_strided_slice %128 {offsets = [0, 52], sizes = [8, 128], strides = [1, 1]} : vector<8x204xbf16> to vector<8x128xbf16>
    %156 = vector.extract_strided_slice %128 {offsets = [0, 54], sizes = [8, 128], strides = [1, 1]} : vector<8x204xbf16> to vector<8x128xbf16>
    %157 = vector.extract_strided_slice %128 {offsets = [0, 56], sizes = [8, 128], strides = [1, 1]} : vector<8x204xbf16> to vector<8x128xbf16>
    %158 = vector.extract_strided_slice %128 {offsets = [0, 58], sizes = [8, 128], strides = [1, 1]} : vector<8x204xbf16> to vector<8x128xbf16>
    %159 = vector.extract_strided_slice %128 {offsets = [0, 60], sizes = [8, 128], strides = [1, 1]} : vector<8x204xbf16> to vector<8x128xbf16>
    %160 = vector.extract_strided_slice %128 {offsets = [0, 62], sizes = [8, 128], strides = [1, 1]} : vector<8x204xbf16> to vector<8x128xbf16>
    %161 = vector.extract_strided_slice %128 {offsets = [0, 64], sizes = [8, 128], strides = [1, 1]} : vector<8x204xbf16> to vector<8x128xbf16>
    %162 = vector.extract_strided_slice %128 {offsets = [0, 66], sizes = [8, 128], strides = [1, 1]} : vector<8x204xbf16> to vector<8x128xbf16>
    %163 = vector.extract_strided_slice %128 {offsets = [0, 68], sizes = [8, 128], strides = [1, 1]} : vector<8x204xbf16> to vector<8x128xbf16>
    %164 = vector.extract_strided_slice %128 {offsets = [0, 70], sizes = [8, 128], strides = [1, 1]} : vector<8x204xbf16> to vector<8x128xbf16>
    %165 = vector.extract_strided_slice %128 {offsets = [0, 72], sizes = [8, 128], strides = [1, 1]} : vector<8x204xbf16> to vector<8x128xbf16>
    %166 = vector.extract_strided_slice %128 {offsets = [0, 74], sizes = [8, 128], strides = [1, 1]} : vector<8x204xbf16> to vector<8x128xbf16>
    %167 = vector.extract_strided_slice %128 {offsets = [0, 76], sizes = [8, 128], strides = [1, 1]} : vector<8x204xbf16> to vector<8x128xbf16>
    %168 = tpu.concatenate %129, %130, %131, %132, %133, %134, %135, %136, %137, %138, %139, %140, %141, %142, %143, %144 in 0 : vector<8x128xbf16>, vector<8x128xbf16>, vector<8x128xbf16>, vector<8x128xbf16>, vector<8x128xbf16>, vector<8x128xbf16>, vector<8x128xbf16>, vector<8x128xbf16>, vector<8x128xbf16>, vector<8x128xbf16>, vector<8x128xbf16>, vector<8x128xbf16>, vector<8x128xbf16>, vector<8x128xbf16>, vector<8x128xbf16>, vector<8x128xbf16> -> vector<128x128xbf16>
    %169 = tpu.concatenate %145, %146, %147, %148, %149, %150, %151, %152, %153, %154, %155, %156, %157, %158, %159, %160 in 0 : vector<8x128xbf16>, vector<8x128xbf16>, vector<8x128xbf16>, vector<8x128xbf16>, vector<8x128xbf16>, vector<8x128xbf16>, vector<8x128xbf16>, vector<8x128xbf16>, vector<8x128xbf16>, vector<8x128xbf16>, vector<8x128xbf16>, vector<8x128xbf16>, vector<8x128xbf16>, vector<8x128xbf16>, vector<8x128xbf16>, vector<8x128xbf16> -> vector<128x128xbf16>
    %170 = tpu.concatenate %161, %162, %163, %164, %165, %166, %167 in 0 : vector<8x128xbf16>, vector<8x128xbf16>, vector<8x128xbf16>, vector<8x128xbf16>, vector<8x128xbf16>, vector<8x128xbf16>, vector<8x128xbf16> -> vector<56x128xbf16>
    %171 = tpu.concatenate %168, %169, %170 in 0 : vector<128x128xbf16>, vector<128x128xbf16>, vector<56x128xbf16> -> vector<312x128xbf16>
    %cst_42 = arith.constant dense<0.000000e+00> : vector<4x128xf32>
    %172 = tpu.matmul %122, %171, %cst_42 {dimension_numbers = #tpu.dot_dimension_numbers<[1], [0], [0], [1], [0, 0, 1, 1], [], []>} : vector<4x312xbf16>, vector<312x128xbf16>, vector<4x128xf32> -> vector<4x128xf32>
    %173 = vector.broadcast %0 : vector<1x128xi32> to vector<4x128xi32>
    %174 = arith.cmpi eq, %121, %173 : vector<4x128xi32>
    %cst_43 = arith.constant 0.000000e+00 : f32
    %175 = vector.broadcast %cst_43 : f32 to vector<4x128xf32>
    %176 = arith.select %174, %120, %175 : vector<4x128xi1>, vector<4x128xf32>
    %c2_i32_44 = arith.constant 2 : i32
    %177 = vector.broadcast %c2_i32_44 : i32 to vector<1x128xi32>
    %178 = arith.addi %0, %177 : vector<1x128xi32>
    %179 = vector.broadcast %178 : vector<1x128xi32> to vector<4x128xi32>
    %180 = arith.cmpi eq, %121, %179 : vector<4x128xi32>
    %cst_45 = arith.constant 0.000000e+00 : f32
    %181 = vector.broadcast %cst_45 : f32 to vector<4x128xf32>
    %182 = arith.select %180, %120, %181 : vector<4x128xi1>, vector<4x128xf32>
    %c2_i32_46 = arith.constant 2 : i32
    %183 = tpu.dynamic_rotate %182 by %c2_i32_46 dim 1 : vector<4x128xf32>, i32 -> vector<4x128xf32>
    %184 = arith.addf %176, %183 : vector<4x128xf32>
    %c-2_i32_47 = arith.constant -2 : i32
    %185 = vector.broadcast %c-2_i32_47 : i32 to vector<1x128xi32>
    %186 = arith.addi %0, %185 : vector<1x128xi32>
    %187 = vector.broadcast %186 : vector<1x128xi32> to vector<4x128xi32>
    %188 = arith.cmpi eq, %121, %187 : vector<4x128xi32>
    %cst_48 = arith.constant 0.000000e+00 : f32
    %189 = vector.broadcast %cst_48 : f32 to vector<4x128xf32>
    %190 = arith.select %188, %120, %189 : vector<4x128xi1>, vector<4x128xf32>
    %c126_i32_49 = arith.constant 126 : i32
    %191 = tpu.dynamic_rotate %190 by %c126_i32_49 dim 1 : vector<4x128xf32>, i32 -> vector<4x128xf32>
    %192 = arith.addf %184, %191 : vector<4x128xf32>
    %193 = arith.addf %172, %192 : vector<4x128xf32>
    %cst_50 = arith.constant 0.000000e+00 : f32
    %194 = vector.shape_cast %2 : vector<1x128xi1> to vector<1x128xi1>
    %195 = vector.broadcast %194 : vector<1x128xi1> to vector<4x128xi1>
    %196 = vector.broadcast %cst_50 : f32 to vector<4x128xf32>
    %197 = arith.select %195, %193, %196 : vector<4x128xi1>, vector<4x128xf32>
    %cst_51 = arith.constant dense<0.000000e+00> : vector<4xf32>
    %198 = vector.multi_reduction <add>, %197, %cst_51 [1] : vector<4x128xf32> to vector<4xf32>
    %199 = vector.shape_cast %198 : vector<4xf32> to vector<4x1xf32>
    %cst_52 = arith.constant 0.020833334 : f32
    %200 = vector.broadcast %cst_52 : f32 to vector<4x1xf32>
    %201 = arith.mulf %199, %200 : vector<4x1xf32>
    %202 = arith.mulf %197, %197 : vector<4x128xf32>
    %cst_53 = arith.constant dense<0.000000e+00> : vector<4xf32>
    %203 = vector.multi_reduction <add>, %202, %cst_53 [1] : vector<4x128xf32> to vector<4xf32>
    %204 = vector.shape_cast %203 : vector<4xf32> to vector<4x1xf32>
    %cst_54 = arith.constant 0.020833334 : f32
    %205 = vector.broadcast %cst_54 : f32 to vector<4x1xf32>
    %206 = arith.mulf %204, %205 : vector<4x1xf32>
    %207 = arith.mulf %201, %201 : vector<4x1xf32>
    %208 = arith.subf %206, %207 : vector<4x1xf32>
    %cst_55 = arith.constant 0.000000e+00 : f32
    %209 = vector.broadcast %cst_55 : f32 to vector<4x1xf32>
    %210 = arith.maximumf %208, %209 : vector<4x1xf32>
    %211 = vector.broadcast %201 : vector<4x1xf32> to vector<4x128xf32>
    %212 = arith.subf %193, %211 : vector<4x128xf32>
    %cst_56 = arith.constant 9.99999974E-6 : f32
    %213 = vector.broadcast %cst_56 : f32 to vector<4x1xf32>
    %214 = arith.addf %210, %213 : vector<4x1xf32>
    %215 = math.rsqrt %214 : vector<4x1xf32>
    %216 = vector.broadcast %215 : vector<4x1xf32> to vector<4x128xf32>
    %217 = arith.mulf %212, %216 : vector<4x128xf32>
    %218 = vector.broadcast %123 : vector<4x1xf32> to vector<4x128xf32>
    %219 = arith.mulf %217, %218 : vector<4x128xf32>
    %220 = vector.broadcast %124 : vector<4x1xf32> to vector<4x128xf32>
    %221 = arith.addf %219, %220 : vector<4x128xf32>
    %cst_57 = arith.constant 0.000000e+00 : f32
    %222 = vector.broadcast %cst_57 : f32 to vector<4x128xf32>
    %223 = arith.maximumf %221, %222 : vector<4x128xf32>
    %cst_58 = arith.constant 0.000000e+00 : f32
    %224 = vector.shape_cast %2 : vector<1x128xi1> to vector<1x128xi1>
    %225 = vector.broadcast %224 : vector<1x128xi1> to vector<4x128xi1>
    %226 = vector.broadcast %cst_58 : f32 to vector<4x128xf32>
    %227 = arith.select %225, %223, %226 : vector<4x128xi1>, vector<4x128xf32>
    %228 = arith.truncf %227 : vector<4x128xf32> to vector<4x128xbf16>
    %c0_59 = arith.constant 0 : index
    %c0_60 = arith.constant 0 : index
    %229 = vector.load %arg13[%c0_59, %c0_60] : memref<8x4xbf16, #tpu.memory_space<vmem>>, vector<8x4xbf16>
    %cst_61 = arith.constant dense<0.000000e+00> : vector<8x128xf32>
    %230 = tpu.matmul %229, %228, %cst_61 {dimension_numbers = #tpu.dot_dimension_numbers<[1], [0], [0], [1], [0, 0, 1, 1], [], []>} : vector<8x4xbf16>, vector<4x128xbf16>, vector<8x128xf32> -> vector<8x128xf32>
    %c0_62 = arith.constant 0 : index
    %c0_63 = arith.constant 0 : index
    %231 = vector.load %arg3[%c0_62, %c0_63] : memref<8x128xi32, #tpu.memory_space<vmem>>, vector<8x128xi32>
    %c0_64 = arith.constant 0 : index
    %c0_65 = arith.constant 0 : index
    %232 = vector.load %arg12[%c0_64, %c0_65] : memref<8x312xbf16, #tpu.memory_space<vmem>>, vector<8x312xbf16>
    %c0_66 = arith.constant 0 : index
    %c0_67 = arith.constant 0 : index
    %233 = vector.load %arg14[%c0_66, %c0_67] : memref<8x1xf32, #tpu.memory_space<vmem>>, vector<8x1xf32>
    %c0_68 = arith.constant 0 : index
    %c0_69 = arith.constant 0 : index
    %234 = vector.load %arg15[%c0_68, %c0_69] : memref<8x1xf32, #tpu.memory_space<vmem>>, vector<8x1xf32>
    %cst_70 = arith.constant 0.000000e+00 : bf16
    %235 = vector.broadcast %cst_70 : bf16 to vector<4x128xbf16>
    %236 = tpu.concatenate %228, %235 in 0 : vector<4x128xbf16>, vector<4x128xbf16> -> vector<8x128xbf16>
    %cst_71 = arith.constant 0.000000e+00 : bf16
    %237 = vector.broadcast %cst_71 : bf16 to vector<8x38xbf16>
    %238 = tpu.concatenate %237, %236, %237 in 1 : vector<8x38xbf16>, vector<8x128xbf16>, vector<8x38xbf16> -> vector<8x204xbf16>
    %239 = vector.extract_strided_slice %238 {offsets = [0, 0], sizes = [8, 128], strides = [1, 1]} : vector<8x204xbf16> to vector<8x128xbf16>
    %240 = vector.extract_strided_slice %238 {offsets = [0, 2], sizes = [8, 128], strides = [1, 1]} : vector<8x204xbf16> to vector<8x128xbf16>
    %241 = vector.extract_strided_slice %238 {offsets = [0, 4], sizes = [8, 128], strides = [1, 1]} : vector<8x204xbf16> to vector<8x128xbf16>
    %242 = vector.extract_strided_slice %238 {offsets = [0, 6], sizes = [8, 128], strides = [1, 1]} : vector<8x204xbf16> to vector<8x128xbf16>
    %243 = vector.extract_strided_slice %238 {offsets = [0, 8], sizes = [8, 128], strides = [1, 1]} : vector<8x204xbf16> to vector<8x128xbf16>
    %244 = vector.extract_strided_slice %238 {offsets = [0, 10], sizes = [8, 128], strides = [1, 1]} : vector<8x204xbf16> to vector<8x128xbf16>
    %245 = vector.extract_strided_slice %238 {offsets = [0, 12], sizes = [8, 128], strides = [1, 1]} : vector<8x204xbf16> to vector<8x128xbf16>
    %246 = vector.extract_strided_slice %238 {offsets = [0, 14], sizes = [8, 128], strides = [1, 1]} : vector<8x204xbf16> to vector<8x128xbf16>
    %247 = vector.extract_strided_slice %238 {offsets = [0, 16], sizes = [8, 128], strides = [1, 1]} : vector<8x204xbf16> to vector<8x128xbf16>
    %248 = vector.extract_strided_slice %238 {offsets = [0, 18], sizes = [8, 128], strides = [1, 1]} : vector<8x204xbf16> to vector<8x128xbf16>
    %249 = vector.extract_strided_slice %238 {offsets = [0, 20], sizes = [8, 128], strides = [1, 1]} : vector<8x204xbf16> to vector<8x128xbf16>
    %250 = vector.extract_strided_slice %238 {offsets = [0, 22], sizes = [8, 128], strides = [1, 1]} : vector<8x204xbf16> to vector<8x128xbf16>
    %251 = vector.extract_strided_slice %238 {offsets = [0, 24], sizes = [8, 128], strides = [1, 1]} : vector<8x204xbf16> to vector<8x128xbf16>
    %252 = vector.extract_strided_slice %238 {offsets = [0, 26], sizes = [8, 128], strides = [1, 1]} : vector<8x204xbf16> to vector<8x128xbf16>
    %253 = vector.extract_strided_slice %238 {offsets = [0, 28], sizes = [8, 128], strides = [1, 1]} : vector<8x204xbf16> to vector<8x128xbf16>
    %254 = vector.extract_strided_slice %238 {offsets = [0, 30], sizes = [8, 128], strides = [1, 1]} : vector<8x204xbf16> to vector<8x128xbf16>
    %255 = vector.extract_strided_slice %238 {offsets = [0, 32], sizes = [8, 128], strides = [1, 1]} : vector<8x204xbf16> to vector<8x128xbf16>
    %256 = vector.extract_strided_slice %238 {offsets = [0, 34], sizes = [8, 128], strides = [1, 1]} : vector<8x204xbf16> to vector<8x128xbf16>
    %257 = vector.extract_strided_slice %238 {offsets = [0, 36], sizes = [8, 128], strides = [1, 1]} : vector<8x204xbf16> to vector<8x128xbf16>
    %258 = vector.extract_strided_slice %238 {offsets = [0, 38], sizes = [8, 128], strides = [1, 1]} : vector<8x204xbf16> to vector<8x128xbf16>
    %259 = vector.extract_strided_slice %238 {offsets = [0, 40], sizes = [8, 128], strides = [1, 1]} : vector<8x204xbf16> to vector<8x128xbf16>
    %260 = vector.extract_strided_slice %238 {offsets = [0, 42], sizes = [8, 128], strides = [1, 1]} : vector<8x204xbf16> to vector<8x128xbf16>
    %261 = vector.extract_strided_slice %238 {offsets = [0, 44], sizes = [8, 128], strides = [1, 1]} : vector<8x204xbf16> to vector<8x128xbf16>
    %262 = vector.extract_strided_slice %238 {offsets = [0, 46], sizes = [8, 128], strides = [1, 1]} : vector<8x204xbf16> to vector<8x128xbf16>
    %263 = vector.extract_strided_slice %238 {offsets = [0, 48], sizes = [8, 128], strides = [1, 1]} : vector<8x204xbf16> to vector<8x128xbf16>
    %264 = vector.extract_strided_slice %238 {offsets = [0, 50], sizes = [8, 128], strides = [1, 1]} : vector<8x204xbf16> to vector<8x128xbf16>
    %265 = vector.extract_strided_slice %238 {offsets = [0, 52], sizes = [8, 128], strides = [1, 1]} : vector<8x204xbf16> to vector<8x128xbf16>
    %266 = vector.extract_strided_slice %238 {offsets = [0, 54], sizes = [8, 128], strides = [1, 1]} : vector<8x204xbf16> to vector<8x128xbf16>
    %267 = vector.extract_strided_slice %238 {offsets = [0, 56], sizes = [8, 128], strides = [1, 1]} : vector<8x204xbf16> to vector<8x128xbf16>
    %268 = vector.extract_strided_slice %238 {offsets = [0, 58], sizes = [8, 128], strides = [1, 1]} : vector<8x204xbf16> to vector<8x128xbf16>
    %269 = vector.extract_strided_slice %238 {offsets = [0, 60], sizes = [8, 128], strides = [1, 1]} : vector<8x204xbf16> to vector<8x128xbf16>
    %270 = vector.extract_strided_slice %238 {offsets = [0, 62], sizes = [8, 128], strides = [1, 1]} : vector<8x204xbf16> to vector<8x128xbf16>
    %271 = vector.extract_strided_slice %238 {offsets = [0, 64], sizes = [8, 128], strides = [1, 1]} : vector<8x204xbf16> to vector<8x128xbf16>
    %272 = vector.extract_strided_slice %238 {offsets = [0, 66], sizes = [8, 128], strides = [1, 1]} : vector<8x204xbf16> to vector<8x128xbf16>
    %273 = vector.extract_strided_slice %238 {offsets = [0, 68], sizes = [8, 128], strides = [1, 1]} : vector<8x204xbf16> to vector<8x128xbf16>
    %274 = vector.extract_strided_slice %238 {offsets = [0, 70], sizes = [8, 128], strides = [1, 1]} : vector<8x204xbf16> to vector<8x128xbf16>
    %275 = vector.extract_strided_slice %238 {offsets = [0, 72], sizes = [8, 128], strides = [1, 1]} : vector<8x204xbf16> to vector<8x128xbf16>
    %276 = vector.extract_strided_slice %238 {offsets = [0, 74], sizes = [8, 128], strides = [1, 1]} : vector<8x204xbf16> to vector<8x128xbf16>
    %277 = vector.extract_strided_slice %238 {offsets = [0, 76], sizes = [8, 128], strides = [1, 1]} : vector<8x204xbf16> to vector<8x128xbf16>
    %278 = tpu.concatenate %239, %240, %241, %242, %243, %244, %245, %246, %247, %248, %249, %250, %251, %252, %253, %254 in 0 : vector<8x128xbf16>, vector<8x128xbf16>, vector<8x128xbf16>, vector<8x128xbf16>, vector<8x128xbf16>, vector<8x128xbf16>, vector<8x128xbf16>, vector<8x128xbf16>, vector<8x128xbf16>, vector<8x128xbf16>, vector<8x128xbf16>, vector<8x128xbf16>, vector<8x128xbf16>, vector<8x128xbf16>, vector<8x128xbf16>, vector<8x128xbf16> -> vector<128x128xbf16>
    %279 = tpu.concatenate %255, %256, %257, %258, %259, %260, %261, %262, %263, %264, %265, %266, %267, %268, %269, %270 in 0 : vector<8x128xbf16>, vector<8x128xbf16>, vector<8x128xbf16>, vector<8x128xbf16>, vector<8x128xbf16>, vector<8x128xbf16>, vector<8x128xbf16>, vector<8x128xbf16>, vector<8x128xbf16>, vector<8x128xbf16>, vector<8x128xbf16>, vector<8x128xbf16>, vector<8x128xbf16>, vector<8x128xbf16>, vector<8x128xbf16>, vector<8x128xbf16> -> vector<128x128xbf16>
    %280 = tpu.concatenate %271, %272, %273, %274, %275, %276, %277 in 0 : vector<8x128xbf16>, vector<8x128xbf16>, vector<8x128xbf16>, vector<8x128xbf16>, vector<8x128xbf16>, vector<8x128xbf16>, vector<8x128xbf16> -> vector<56x128xbf16>
    %281 = tpu.concatenate %278, %279, %280 in 0 : vector<128x128xbf16>, vector<128x128xbf16>, vector<56x128xbf16> -> vector<312x128xbf16>
    %cst_72 = arith.constant dense<0.000000e+00> : vector<8x128xf32>
    %282 = tpu.matmul %232, %281, %cst_72 {dimension_numbers = #tpu.dot_dimension_numbers<[1], [0], [0], [1], [0, 0, 1, 1], [], []>} : vector<8x312xbf16>, vector<312x128xbf16>, vector<8x128xf32> -> vector<8x128xf32>
    %283 = vector.broadcast %0 : vector<1x128xi32> to vector<8x128xi32>
    %284 = arith.cmpi eq, %231, %283 : vector<8x128xi32>
    %cst_73 = arith.constant 0.000000e+00 : f32
    %285 = vector.broadcast %cst_73 : f32 to vector<8x128xf32>
    %286 = arith.select %284, %230, %285 : vector<8x128xi1>, vector<8x128xf32>
    %c2_i32_74 = arith.constant 2 : i32
    %287 = vector.broadcast %c2_i32_74 : i32 to vector<1x128xi32>
    %288 = arith.addi %0, %287 : vector<1x128xi32>
    %289 = vector.broadcast %288 : vector<1x128xi32> to vector<8x128xi32>
    %290 = arith.cmpi eq, %231, %289 : vector<8x128xi32>
    %cst_75 = arith.constant 0.000000e+00 : f32
    %291 = vector.broadcast %cst_75 : f32 to vector<8x128xf32>
    %292 = arith.select %290, %230, %291 : vector<8x128xi1>, vector<8x128xf32>
    %c2_i32_76 = arith.constant 2 : i32
    %293 = tpu.dynamic_rotate %292 by %c2_i32_76 dim 1 : vector<8x128xf32>, i32 -> vector<8x128xf32>
    %294 = arith.addf %286, %293 : vector<8x128xf32>
    %c-2_i32_77 = arith.constant -2 : i32
    %295 = vector.broadcast %c-2_i32_77 : i32 to vector<1x128xi32>
    %296 = arith.addi %0, %295 : vector<1x128xi32>
    %297 = vector.broadcast %296 : vector<1x128xi32> to vector<8x128xi32>
    %298 = arith.cmpi eq, %231, %297 : vector<8x128xi32>
    %cst_78 = arith.constant 0.000000e+00 : f32
    %299 = vector.broadcast %cst_78 : f32 to vector<8x128xf32>
    %300 = arith.select %298, %230, %299 : vector<8x128xi1>, vector<8x128xf32>
    %c126_i32_79 = arith.constant 126 : i32
    %301 = tpu.dynamic_rotate %300 by %c126_i32_79 dim 1 : vector<8x128xf32>, i32 -> vector<8x128xf32>
    %302 = arith.addf %294, %301 : vector<8x128xf32>
    %303 = arith.addf %282, %302 : vector<8x128xf32>
    %cst_80 = arith.constant 0.000000e+00 : f32
    %304 = vector.shape_cast %2 : vector<1x128xi1> to vector<1x128xi1>
    %305 = vector.broadcast %304 : vector<1x128xi1> to vector<8x128xi1>
    %306 = vector.broadcast %cst_80 : f32 to vector<8x128xf32>
    %307 = arith.select %305, %303, %306 : vector<8x128xi1>, vector<8x128xf32>
    %cst_81 = arith.constant dense<0.000000e+00> : vector<8xf32>
    %308 = vector.multi_reduction <add>, %307, %cst_81 [1] : vector<8x128xf32> to vector<8xf32>
    %309 = vector.shape_cast %308 : vector<8xf32> to vector<8x1xf32>
    %cst_82 = arith.constant 0.020833334 : f32
    %310 = vector.broadcast %cst_82 : f32 to vector<8x1xf32>
    %311 = arith.mulf %309, %310 : vector<8x1xf32>
    %312 = arith.mulf %307, %307 : vector<8x128xf32>
    %cst_83 = arith.constant dense<0.000000e+00> : vector<8xf32>
    %313 = vector.multi_reduction <add>, %312, %cst_83 [1] : vector<8x128xf32> to vector<8xf32>
    %314 = vector.shape_cast %313 : vector<8xf32> to vector<8x1xf32>
    %cst_84 = arith.constant 0.020833334 : f32
    %315 = vector.broadcast %cst_84 : f32 to vector<8x1xf32>
    %316 = arith.mulf %314, %315 : vector<8x1xf32>
    %317 = arith.mulf %311, %311 : vector<8x1xf32>
    %318 = arith.subf %316, %317 : vector<8x1xf32>
    %cst_85 = arith.constant 0.000000e+00 : f32
    %319 = vector.broadcast %cst_85 : f32 to vector<8x1xf32>
    %320 = arith.maximumf %318, %319 : vector<8x1xf32>
    %321 = vector.broadcast %311 : vector<8x1xf32> to vector<8x128xf32>
    %322 = arith.subf %303, %321 : vector<8x128xf32>
    %cst_86 = arith.constant 9.99999974E-6 : f32
    %323 = vector.broadcast %cst_86 : f32 to vector<8x1xf32>
    %324 = arith.addf %320, %323 : vector<8x1xf32>
    %325 = math.rsqrt %324 : vector<8x1xf32>
    %326 = vector.broadcast %325 : vector<8x1xf32> to vector<8x128xf32>
    %327 = arith.mulf %322, %326 : vector<8x128xf32>
    %328 = vector.broadcast %233 : vector<8x1xf32> to vector<8x128xf32>
    %329 = arith.mulf %327, %328 : vector<8x128xf32>
    %330 = vector.broadcast %234 : vector<8x1xf32> to vector<8x128xf32>
    %331 = arith.addf %329, %330 : vector<8x128xf32>
    %cst_87 = arith.constant 0.000000e+00 : f32
    %332 = vector.broadcast %cst_87 : f32 to vector<8x128xf32>
    %333 = arith.maximumf %331, %332 : vector<8x128xf32>
    %cst_88 = arith.constant 0.000000e+00 : f32
    %334 = vector.shape_cast %2 : vector<1x128xi1> to vector<1x128xi1>
    %335 = vector.broadcast %334 : vector<1x128xi1> to vector<8x128xi1>
    %336 = vector.broadcast %cst_88 : f32 to vector<8x128xf32>
    %337 = arith.select %335, %333, %336 : vector<8x128xi1>, vector<8x128xf32>
    %c0_89 = arith.constant 0 : index
    %c0_90 = arith.constant 0 : index
    %338 = vector.load %arg17[%c0_89, %c0_90] : memref<8x1xf32, #tpu.memory_space<vmem>>, vector<8x1xf32>
    %c0_91 = arith.constant 0 : index
    %c0_92 = arith.constant 0 : index
    %339 = vector.load %arg18[%c0_91, %c0_92] : memref<8x1xf32, #tpu.memory_space<vmem>>, vector<8x1xf32>
    %cst_93 = arith.constant 0.000000e+00 : f32
    %340 = vector.shape_cast %2 : vector<1x128xi1> to vector<1x128xi1>
    %341 = vector.broadcast %340 : vector<1x128xi1> to vector<8x128xi1>
    %342 = vector.broadcast %cst_93 : f32 to vector<8x128xf32>
    %343 = arith.select %341, %10, %342 : vector<8x128xi1>, vector<8x128xf32>
    %cst_94 = arith.constant dense<0.000000e+00> : vector<8xf32>
    %344 = vector.multi_reduction <add>, %343, %cst_94 [1] : vector<8x128xf32> to vector<8xf32>
    %345 = vector.shape_cast %344 : vector<8xf32> to vector<8x1xf32>
    %cst_95 = arith.constant 0.020833334 : f32
    %346 = vector.broadcast %cst_95 : f32 to vector<8x1xf32>
    %347 = arith.mulf %345, %346 : vector<8x1xf32>
    %348 = arith.mulf %343, %343 : vector<8x128xf32>
    %cst_96 = arith.constant dense<0.000000e+00> : vector<8xf32>
    %349 = vector.multi_reduction <add>, %348, %cst_96 [1] : vector<8x128xf32> to vector<8xf32>
    %350 = vector.shape_cast %349 : vector<8xf32> to vector<8x1xf32>
    %cst_97 = arith.constant 0.020833334 : f32
    %351 = vector.broadcast %cst_97 : f32 to vector<8x1xf32>
    %352 = arith.mulf %350, %351 : vector<8x1xf32>
    %353 = arith.mulf %347, %347 : vector<8x1xf32>
    %354 = arith.subf %352, %353 : vector<8x1xf32>
    %cst_98 = arith.constant 0.000000e+00 : f32
    %355 = vector.broadcast %cst_98 : f32 to vector<8x1xf32>
    %356 = arith.maximumf %354, %355 : vector<8x1xf32>
    %357 = vector.broadcast %347 : vector<8x1xf32> to vector<8x128xf32>
    %358 = arith.subf %10, %357 : vector<8x128xf32>
    %cst_99 = arith.constant 9.99999974E-6 : f32
    %359 = vector.broadcast %cst_99 : f32 to vector<8x1xf32>
    %360 = arith.addf %356, %359 : vector<8x1xf32>
    %361 = math.rsqrt %360 : vector<8x1xf32>
    %362 = vector.broadcast %361 : vector<8x1xf32> to vector<8x128xf32>
    %363 = arith.mulf %358, %362 : vector<8x128xf32>
    %364 = vector.broadcast %338 : vector<8x1xf32> to vector<8x128xf32>
    %365 = arith.mulf %363, %364 : vector<8x128xf32>
    %366 = vector.broadcast %339 : vector<8x1xf32> to vector<8x128xf32>
    %367 = arith.addf %365, %366 : vector<8x128xf32>
    %368 = arith.addf %337, %367 : vector<8x128xf32>
    %cst_100 = arith.constant 0.000000e+00 : f32
    %369 = vector.broadcast %cst_100 : f32 to vector<8x128xf32>
    %370 = arith.maximumf %368, %369 : vector<8x128xf32>
    %c0_101 = arith.constant 0 : index
    %c0_102 = arith.constant 0 : index
    %371 = vector.load %arg19[%c0_101, %c0_102] : memref<8x128xf32, #tpu.memory_space<vmem>>, vector<8x128xf32>
    tpu.vector_store %arg19[%c0_101, %c0_102], %370 {strides = array<i32>} : memref<8x128xf32, #tpu.memory_space<vmem>>, vector<8x128xf32>,
    return
  }
}

</mosaic_0001>

<bundles_post_ra>
// kernel: inception_transpose_block.1
= control target key start
LH: loop header
LB: loop body
LE: loop exit
PB: predicated region body
PF: predicated region fallthrough
CT: control target
= control target key end

     0   :  { %vm78_vm0 = vcmask 1041408   ;;  %s1604_s21 = smov 38   ;;  %v1605_v2 = vmov 0.0   ;;  %vm1606_vm1 = vmmov 0   ;;  %vm74_vm2 = vcmask 31744   ;;  %s1607_s23 = smov 100   ;;  %s2417_s0 = inlined_call_operand.vmem [shape: bf16[4,128], index: 0, kind: input, shape index: {}]   ;;  %s2418_s5 = inlined_call_operand.vmem [shape: bf16[16,4], index: 5, kind: input, shape index: {}]   ;;  %s2419_s4 = inlined_call_operand.vmem [shape: bf16[4,312], index: 4, kind: input, shape index: {}]   ;;  %s2420_s1 = inlined_call_operand.vmem [shape: s32[4,128], index: 1, kind: input, shape index: {}]   ;;  %s2421_s7 = inlined_call_operand.vmem [shape: f32[4,1], index: 7, kind: input, shape index: {}]   ;;  %s2422_s6 = inlined_call_operand.vmem [shape: f32[4,1], index: 6, kind: input, shape index: {}]   ;;  %s2423_s9 = inlined_call_operand.vmem [shape: bf16[4,4], index: 9, kind: input, shape index: {}]   ;;  %s2424_s8 = inlined_call_operand.vmem [shape: bf16[4,312], index: 8, kind: input, shape index: {}]   ;;  %s2425_s2 = inlined_call_operand.vmem [shape: s32[4,128], index: 2, kind: input, shape index: {}]   ;;  %s2426_s11 = inlined_call_operand.vmem [shape: f32[4,1], index: 11, kind: input, shape index: {}]   ;;  %s2427_s10 = inlined_call_operand.vmem [shape: f32[4,1], index: 10, kind: input, shape index: {}]   ;;  %s2428_s13 = inlined_call_operand.vmem [shape: bf16[8,4], index: 13, kind: input, shape index: {}]   ;;  %s2429_s12 = inlined_call_operand.vmem [shape: bf16[8,312], index: 12, kind: input, shape index: {}]   ;;  %s2430_s3 = inlined_call_operand.vmem [shape: s32[8,128], index: 3, kind: input, shape index: {}]   ;;  %s2431_s16 = inlined_call_operand.vmem [shape: f32[8,1], index: 16, kind: input, shape index: {}]   ;;  %s2432_s14 = inlined_call_operand.vmem [shape: f32[8,1], index: 14, kind: input, shape index: {}]   ;;  %s2433_s17 = inlined_call_operand.vmem [shape: f32[8,1], index: 17, kind: input, shape index: {}]   ;;  %s2434_s18 = inlined_call_operand.vmem [shape: f32[8,1], index: 18, kind: input, shape index: {}]   ;;  %s2435_s15 = inlined_call_operand.vmem [shape: f32[8,1], index: 15, kind: input, shape index: {}]   ;;  %s2436_s19 = inlined_call_operand.vmem [shape: f32[8,128], index: 19, kind: output, shape index: {}]  }
   0x1   :  { %2470 = sst [smem:[#allocation2_spill]] %s2417_s0  ;;  %1511 = vmatprep.subr.bf16.mxu0 %v1605_v2  ;;  %1513 = vmatprep.mubr.msk.bf16.mxu0 %vm1606_vm1, %v1605_v2  ;;  %vm139_vm3 = vcmask 310272   ;;  %s1608_s24 = smov 104   ;;  %vm181_vm4 = vcmask 949248   ;;  %vm229_vm5 = vcmask 818176   ;;  %vm235_vm6 = vcmask 801792  }
   0x2   :  { %2471 = sst [smem:[#allocation3_spill]] %s2418_s5  ;;  %s1609_s25 = smov 108   ;;  %vm237_vm7 = vcmask 1043456   ;;  %vm2462_vm8 = vcmask 850944   ;;  %vm2461_vm9 = vcmask 834560   ;;  %vm205_vm10 = vcmask 883712  }
   0x3   :  { %2472 = sst [smem:[#allocation4_spill]] %s2419_s4  ;;  %s1611_s26 = smov 116   ;;  %vm2463_vm11 = vcmask 867328   ;;  %vm2451_vm12 = vcmask 916480   ;;  %vm2443_vm13 = vcmask 900096   ;;  %vm2450_vm14 = vcmask 932864  }
   0x4   :  { %2473 = sst [smem:[#allocation5_spill]] %s2420_s1  ;;  %s1610_s1 = smov 112   ;;  %v63_v52 = vlaneseq  ;;  %v1624_v53 = vmov 1983009808   ;;  %vm2456_vm15 = vcmask 982016  }
   0x5   :  { %s2474_s20 = sld [smem:[#allocation2_spill]]  ;;  %s1612_s27 = smov 120   ;;  %v398_v54 = vunpack.c.l.s4 %v1624_v53 }
   0x6   :  { %s2475_s4 = sld [smem:[#allocation3_spill]]  ;;  %s2466_s28 = smov 124   ;;  %v401_v59 = vshrl.u32 %v63_v52, 7 }
   0x7   :  { %s2437_s29 = smov 98   ;;  %s2464_s0 = smov 102   ;;  %v399_v58 = vunpack.c.0.s8 %v398_v54 }
   0x8   :  { %s2448_s30 = smov 106   ;;  %s2444_s5 = smov 114  }
   0x9   :  { %s2439_s22 = smov 118   ;;  %v1851_v62 = vsub.s32 %v399_v58, %v401_v59 }
   0xb   :  { %v66_v0 = vld [vmem:[%s2474_s20] sm:$0x3]  ;;  %s2446_s20 = smov 110  }
   0xc   :  { %v80_v1 = vsel %vm78_vm0, %v66_v0, 0  ;;  %v1590_v3 = vld [vmem:[%s2475_s4] sm:$0xff]   ;;  %s2441_s4 = smov 122  }
   0xd   :  { %137 = vrot.lane.b32.xlu0 %v80_v1, %s1604_s21  ;;  %1512 = vmatpush3.bf16.msra.mxu0 %v80_v1 }
   0xe   :  { %1517 = vmatprep.subr.bf16.mxu0 %v1605_v2 }
  0x10   :  { %1514 = vmatmul.mubr.msk.bf16.vlgmr.msra.gmra.mxu0 %vm74_vm2, %v1590_v3 }
  0x11   :  { %1525 = vmatprep.mubr.msk.bf16.mxu0 %vm1606_vm1, %v1605_v2 }
  0x7f   :  { %v138_v4 = vpop.permute.xlu0 %137 }
  0x80   :  { %v1743_v5 = vsel %vm139_vm3, 0, %v138_v4  ;;  %v1746_v6 = vsel %vm139_vm3, %v138_v4, 0 }
  0x81   :  { %227 = vrot.lane.b32.xlu1 %v1746_v6, %s1607_s23  ;;  %225 = vrot.lane.b32.xlu0 %v1743_v5, %s1607_s23  ;;  %v145_v7 = vrot.slane %v1743_v5, 4  ;;  %v146_v8 = vrot.slane %v1746_v6, 4 }
  0x85   :  { %213 = vrot.lane.b32.xlu1 %v1743_v5, %s1608_s24  ;;  %215 = vrot.lane.b32.xlu0 %v1746_v6, %s1608_s24 }
  0x89   :  { %201 = vrot.lane.b32.xlu1 %v1743_v5, %s1609_s25  ;;  %203 = vrot.lane.b32.xlu0 %v1746_v6, %s1609_s25 }
  0x8d   :  { %189 = vrot.lane.b32.xlu1 %v1743_v5, %s1610_s1  ;;  %191 = vrot.lane.b32.xlu0 %v1746_v6, %s1610_s1 }
  0x91   :  { %177 = vrot.lane.b32.xlu1 %v1743_v5, %s1611_s26  ;;  %179 = vrot.lane.b32.xlu0 %v1746_v6, %s1611_s26 }
  0x95   :  { %165 = vrot.lane.b32.xlu1 %v1743_v5, %s1612_s27  ;;  %167 = vrot.lane.b32.xlu0 %v1746_v6, %s1612_s27 }
  0x99   :  { %153 = vrot.lane.b32.xlu1 %v1743_v5, %s2466_s28  ;;  %155 = vrot.lane.b32.xlu0 %v1746_v6, %s2466_s28 }
  0x9d   :  { %233 = vrot.lane.b32.xlu0 %v146_v8, %s2437_s29  ;;  %231 = vrot.lane.b32.xlu1 %v145_v7, %s2437_s29  ;;  %s1621_s29 = smov 126  }
  0xa1   :  { %221 = vrot.lane.b32.xlu0 %v146_v8, %s2464_s0  ;;  %219 = vrot.lane.b32.xlu1 %v145_v7, %s2464_s0 }
  0xa5   :  { %209 = vrot.lane.b32.xlu0 %v146_v8, %s2448_s30  ;;  %207 = vrot.lane.b32.xlu1 %v145_v7, %s2448_s30  ;;  %s2476_s30 = sld [smem:[#allocation4_spill]] }
  0xa9   :  { %197 = vrot.lane.b32.xlu0 %v146_v8, %s2446_s20  ;;  %195 = vrot.lane.b32.xlu1 %v145_v7, %s2446_s20  ;;  %s2481_s20 = smov 118  }
  0xab   :  { %v1862_v3 = vld [vmem:[%s2476_s30] sm:$0x3f]  ;;  %s2457_s30 = smov 2  }
  0xad   :  { %185 = vrot.lane.b32.xlu0 %v146_v8, %s2444_s5  ;;  %183 = vrot.lane.b32.xlu1 %v145_v7, %s2444_s5  ;;  %s2477_s5 = sld [smem:[#allocation5_spill]] }
  0xb1   :  { %173 = vrot.lane.b32.xlu0 %v146_v8, %s2439_s22  ;;  %171 = vrot.lane.b32.xlu1 %v145_v7, %s2439_s22  ;;  %s2468_s22 = smov 64  }
  0xb5   :  { %161 = vrot.lane.b32.xlu0 %v146_v8, %s2441_s4  ;;  %159 = vrot.lane.b32.xlu1 %v145_v7, %s2441_s4  ;;  %s2459_s4 = smov 96  }
  0xb9   :  { %149 = vrot.lane.b32.xlu0 %v146_v8, %s1621_s29  ;;  %147 = vrot.lane.b32.xlu1 %v145_v7, %s1621_s29  ;;  %v1870_v7 = vrot.slane %v1862_v3, %v1851_v62 }
  0xd0   :  { %v1796_v20 = vpop.f32.mrf.mxu0 }
  0xd2   :  { %v1515_v21 = vpop.f32.mrf.mxu0 }
  0xd3   :  { %v130_v21 = vld [vmem:[%s2477_s5] sm:$0xf]  ;;  %s2482_s5 = smov 98  }
  0xf3   :  { %v228_v9 = vpop.permute.xlu1 %227  ;;  %v226_v10 = vpop.permute.xlu0 %225 }
  0xf4   :  { %v230_v28 = vsel %vm229_vm5, %v226_v10, %v228_v9  ;;  %v411_v10 = vcombine.high %v1870_v7, %v1870_v7 }
  0xf6   :  { %453 = vmatprep.mubr.bf16.mxu1 %v411_v10 }
  0xf7   :  { %v214_v11 = vpop.permute.xlu1 %213  ;;  %v216_v12 = vpop.permute.xlu0 %215 }
  0xf8   :  { %v218_v34 = vsel %vm2462_vm8, %v214_v11, %v216_v12 }
  0xfb   :  { %v202_v13 = vpop.permute.xlu1 %201  ;;  %v204_v14 = vpop.permute.xlu0 %203 }
  0xfc   :  { %v206_v40 = vsel %vm205_vm10, %v202_v13, %v204_v14 }
  0xff   :  { %v190_v15 = vpop.permute.xlu1 %189  ;;  %v192_v16 = vpop.permute.xlu0 %191 }
 0x100   :  { %v194_v46 = vsel %vm2451_vm12, %v190_v15, %v192_v16  ;;  %vm2454_vm12 = vcmask 998400  }
 0x103   :  { %v178_v17 = vpop.permute.xlu1 %177  ;;  %v180_v18 = vpop.permute.xlu0 %179 }
 0x104   :  { %371 = vrot.lane.b32.xlu0 %v180_v18, %s2468_s22  ;;  %v182_v19 = vsel %vm181_vm4, %v178_v17, %v180_v18 }
 0x105   :  { %369 = vrot.lane.b32.xlu1 %v182_v19, %s2468_s22 }
 0x107   :  { %v1799_v22 = vpop.permute.xlu1 %165  ;;  %v1801_v23 = vpop.permute.xlu0 %167 }
 0x108   :  { %v170_v63 = vsel %vm2456_vm15, %v1799_v22, %v1801_v23  ;;  %vm340_vm15 = vcmask 785408  }
 0x10b   :  { %v1803_v24 = vpop.permute.xlu1 %153  ;;  %v1805_v25 = vpop.permute.xlu0 %155 }
 0x10f   :  { %v234_v26 = vpop.permute.xlu0 %233  ;;  %v232_v27 = vpop.permute.xlu1 %231 }
 0x110   :  { %v236_v29 = vsel %vm235_vm6, %v232_v27, %v234_v26  ;;  %v291_v30 = vsel %vm237_vm7, %v228_v9, %v234_v26 }
 0x111   :  { %338 = vrot.lane.b32.xlu0 %v291_v30, %s2459_s4  ;;  %v1812_v31 = vsel %vm237_vm7, %v230_v28, %v236_v29 }
 0x112   :  { %336 = vrot.lane.b32.xlu1 %v1812_v31, %s2459_s4 }
 0x113   :  { %v222_v32 = vpop.permute.xlu0 %221  ;;  %v220_v33 = vpop.permute.xlu1 %219 }
 0x114   :  { %v224_v35 = vsel %vm2461_vm9, %v220_v33, %v222_v32  ;;  %v288_v36 = vsel %vm237_vm7, %v216_v12, %v222_v32 }
 0x115   :  { %334 = vrot.lane.b32.xlu0 %v288_v36, %s2459_s4  ;;  %v1821_v37 = vsel %vm237_vm7, %v218_v34, %v224_v35 }
 0x116   :  { %332 = vrot.lane.b32.xlu1 %v1821_v37, %s2459_s4 }
 0x117   :  { %v210_v38 = vpop.permute.xlu0 %209  ;;  %v208_v39 = vpop.permute.xlu1 %207 }
 0x118   :  { %v212_v41 = vsel %vm2463_vm11, %v208_v39, %v210_v38  ;;  %v285_v42 = vsel %vm237_vm7, %v204_v14, %v210_v38 }
 0x119   :  { %330 = vrot.lane.b32.xlu0 %v285_v42, %s2459_s4  ;;  %v1830_v43 = vsel %vm237_vm7, %v206_v40, %v212_v41 }
 0x11a   :  { %328 = vrot.lane.b32.xlu1 %v1830_v43, %s2459_s4 }
 0x11b   :  { %v198_v44 = vpop.permute.xlu0 %197  ;;  %v196_v45 = vpop.permute.xlu1 %195 }
 0x11c   :  { %v200_v47 = vsel %vm2443_vm13, %v196_v45, %v198_v44  ;;  %v282_v48 = vsel %vm237_vm7, %v192_v16, %v198_v44  ;;  %vm2452_vm13 = vcmask 965632  }
 0x11d   :  { %326 = vrot.lane.b32.xlu0 %v282_v48, %s2459_s4  ;;  %v1839_v49 = vsel %vm237_vm7, %v194_v46, %v200_v47 }
 0x11e   :  { %324 = vrot.lane.b32.xlu1 %v1839_v49, %s2459_s4 }
 0x11f   :  { %v186_v50 = vpop.permute.xlu0 %185  ;;  %v184_v51 = vpop.permute.xlu1 %183 }
 0x120   :  { %v188_v55 = vsel %vm2450_vm14, %v184_v51, %v186_v50  ;;  %v279_v56 = vsel %vm237_vm7, %v180_v18, %v186_v50  ;;  %vm2455_vm14 = vcmask 1014784   ;;  %v1892_v18 = vand.u32 127, %v63_v52 }
 0x121   :  { %322 = vrot.lane.b32.xlu0 %v279_v56, %s2459_s4  ;;  %v1847_v57 = vsel %vm237_vm7, %v182_v19, %v188_v55  ;;  %v158_v11 = vsel %vm2455_vm14, %v1803_v24, %v1805_v25 }
 0x122   :  { %320 = vrot.lane.b32.xlu1 %v1847_v57, %s2459_s4  ;;  %v1916_v26 = vadd.s32 2, %v1892_v18 }
 0x123   :  { %v174_v60 = vpop.permute.xlu0 %173  ;;  %v172_v61 = vpop.permute.xlu1 %171 }
 0x124   :  { %v176_v0 = vsel %vm2452_vm13, %v172_v61, %v174_v60  ;;  %v276_v1 = vsel %vm237_vm7, %v1801_v23, %v174_v60  ;;  %vm2453_vm13 = vcmask 1031168   ;;  %v1904_v23 = vpop.f32.mrf.mxu0  ;;  %vm384_vm14 = vcmp.eq.s32.totalorder %v130_v21, %v1916_v26 }
 0x125   :  { %318 = vrot.lane.b32.xlu0 %v276_v1, %s2459_s4  ;;  %v1866_v4 = vsel %vm237_vm7, %v170_v63, %v176_v0  ;;  %v385_v27 = vsel %vm384_vm14, %v1796_v20, 0.0  ;;  %v396_v61 = vcombine.high %v1862_v3, %v1862_v3  ;;  %v1626_v3 = vmov 0  }
 0x126   :  { %316 = vrot.lane.b32.xlu1 %v1866_v4, %s2459_s4  ;;  %1588 = vset.pattern.permute.xlu0 %v1626_v3  ;;  %vm65_vm14 = vcmp.lt.s32.totalorder %v1892_v18, 48 }
 0x127   :  { %v162_v8 = vpop.permute.xlu0 %161  ;;  %v160_v9 = vpop.permute.xlu1 %159  ;;  %1589 = vset.pattern.permute.xlu1 %v1626_v3 }
 0x128   :  { %v164_v12 = vsel %vm2454_vm12, %v160_v9, %v162_v8  ;;  %v273_v13 = vsel %vm237_vm7, %v1805_v25, %v162_v8  ;;  %v1516_v25 = vpop.f32.mrf.mxu0 }
 0x129   :  { %314 = vrot.lane.b32.xlu0 %v273_v13, %s2459_s4  ;;  %v1884_v14 = vsel %vm237_vm7, %v158_v11, %v164_v12 }
 0x12a   :  { %312 = vrot.lane.b32.xlu1 %v1884_v14, %s2459_s4 }
 0x12b   :  { %v150_v15 = vpop.permute.xlu0 %149  ;;  %v148_v16 = vpop.permute.xlu1 %147 }
 0x12c   :  { %v152_v17 = vsel %vm2453_vm13, %v148_v16, %v150_v15  ;;  %v270_v19 = vsel %vm237_vm7, %v1746_v6, %v150_v15  ;;  %vm381_vm13 = vcmp.eq.s32.totalorder %v130_v21, %v1892_v18  ;;  %v1913_v6 = vadd.s32 4294967294, %v1892_v18 }
 0x12d   :  { %367 = vrot.lane.b32.xlu0 %v276_v1, %s2468_s22  ;;  %v1902_v22 = vsel %vm237_vm7, %v1743_v5, %v152_v17  ;;  %v1910_v24 = vsel %vm381_vm13, %v1796_v20, 0.0  ;;  %vm373_vm13 = vcmask 523264   ;;  %v410_v1 = vrot.slane %v396_v61, %v1851_v62 }
 0x12e   :  { %365 = vrot.lane.b32.xlu1 %v1866_v4, %s2468_s22  ;;  %vm390_vm12 = vcmp.eq.s32.totalorder %v130_v21, %v1913_v6 }
 0x12f   :  { %v391_v5 = vsel %vm390_vm12, %v1796_v20, 0.0  ;;  %vm414_vm12 = vcmask 457728  }
 0x131   :  { %310 = vrot.lane.b32.xlu0 %v270_v19, %s2459_s4 }
 0x132   :  { %308 = vrot.lane.b32.xlu1 %v1902_v22, %s2459_s4  ;;  %s2479_s4 = smov 110  }
 0x135   :  { %363 = vrot.lane.b32.xlu0 %v273_v13, %s2468_s22 }
 0x136   :  { %361 = vrot.lane.b32.xlu1 %v1884_v14, %s2468_s22 }
 0x139   :  { %359 = vrot.lane.b32.xlu0 %v270_v19, %s2468_s22 }
 0x13a   :  { %357 = vrot.lane.b32.xlu1 %v1902_v22, %s2468_s22 }
 0x13d   :  { %392 = vrot.lane.b32.xlu0 %v391_v5, %s1621_s29 }
 0x13e   :  { %386 = vrot.lane.b32.xlu1 %v385_v27, %s2457_s30  ;;  %s2480_s30 = smov 114  }
 0x176   :  { %v372_v28 = vpop.permute.xlu0 %371 }
 0x177   :  { %v370_v29 = vpop.permute.xlu1 %369 }
 0x178   :  { %v377_v30 = vsel %vm373_vm13, %v370_v29, %v372_v28  ;;  %v133_v29 = vld [vmem:[%s2421_s7] sm:$0xf]  ;;  %s2484_s7 = smov 96  }
 0x179   :  { %v419_v32 = vsel %vm237_vm7, %v377_v30, 0  ;;  %v132_v30 = vld [vmem:[%s2422_s6] sm:$0xf]  ;;  %s2483_s6 = smov 122  }
 0x17a   :  { %1518 = vmatpush3.bf16.msra.mxu0 %v419_v32 }
 0x17b   :  { %1519 = vmatprep.subr.bf16.mxu0 %v1605_v2 }
 0x183   :  { %v339_v33 = vpop.permute.xlu0 %338 }
 0x184   :  { %v337_v34 = vpop.permute.xlu1 %336 }
 0x185   :  { %v348_v20 = vsel %vm340_vm15, %v337_v34, %v339_v33 }
 0x186   :  { %1426 = vmatprep.subr.bf16.mxu1 %v348_v20 }
 0x187   :  { %v335_v35 = vpop.permute.xlu0 %334  ;;  %1427 = vmatpush3.bf16.msra.mxu1 %v1812_v31 }
 0x188   :  { %v333_v36 = vpop.permute.xlu1 %332 }
 0x189   :  { %v347_v38 = vsel %vm340_vm15, %v333_v36, %v335_v35 }
 0x18a   :  { %1428 = vmatprep.subr.bf16.mxu1 %v347_v38 }
 0x18b   :  { %v331_v39 = vpop.permute.xlu0 %330  ;;  %1429 = vmatpush3.bf16.msra.mxu1 %v1821_v37 }
 0x18c   :  { %v329_v40 = vpop.permute.xlu1 %328 }
 0x18d   :  { %v346_v41 = vsel %vm340_vm15, %v329_v40, %v331_v39 }
 0x18e   :  { %1430 = vmatprep.subr.bf16.mxu1 %v346_v41 }
 0x18f   :  { %v327_v42 = vpop.permute.xlu0 %326  ;;  %1431 = vmatpush3.bf16.msra.mxu1 %v1830_v43 }
 0x190   :  { %v325_v44 = vpop.permute.xlu1 %324 }
 0x191   :  { %v345_v45 = vsel %vm340_vm15, %v325_v44, %v327_v42 }
 0x192   :  { %1432 = vmatprep.subr.bf16.mxu1 %v345_v45 }
 0x193   :  { %v323_v46 = vpop.permute.xlu0 %322  ;;  %1433 = vmatpush3.bf16.msra.mxu1 %v1839_v49 }
 0x194   :  { %v321_v31 = vpop.permute.xlu1 %320 }
 0x195   :  { %v344_v47 = vsel %vm340_vm15, %v321_v31, %v323_v46 }
 0x196   :  { %1434 = vmatprep.subr.bf16.mxu1 %v344_v47 }
 0x197   :  { %v319_v48 = vpop.permute.xlu0 %318  ;;  %1435 = vmatpush3.bf16.msra.mxu1 %v1847_v57 }
 0x198   :  { %v317_v37 = vpop.permute.xlu1 %316 }
 0x199   :  { %v343_v50 = vsel %vm340_vm15, %v317_v37, %v319_v48 }
 0x19a   :  { %1436 = vmatprep.subr.bf16.mxu1 %v343_v50 }
 0x19b   :  { %v315_v51 = vpop.permute.xlu0 %314  ;;  %1437 = vmatpush3.bf16.msra.mxu1 %v1866_v4 }
 0x19c   :  { %v313_v43 = vpop.permute.xlu1 %312 }
 0x19d   :  { %v342_v52 = vsel %vm340_vm15, %v313_v43, %v315_v51  ;;  %v535_v51 = vld [vmem:[%s2423_s9] sm:$0x3]  ;;  %s2478_s9 = smov 106  }
 0x19e   :  { %1438 = vmatprep.subr.bf16.mxu1 %v342_v52 }
 0x19f   :  { %v368_v53 = vpop.permute.xlu0 %367  ;;  %1439 = vmatpush3.bf16.msra.mxu1 %v1884_v14 }
 0x1a0   :  { %v366_v49 = vpop.permute.xlu1 %365 }
 0x1a1   :  { %v376_v54 = vsel %vm373_vm13, %v366_v49, %v368_v53 }
 0x1a2   :  { %1520 = vmatpush3.bf16.msra.mxu0 %v376_v54 }
 0x1a3   :  { %v311_v55 = vpop.permute.xlu0 %310  ;;  %1521 = vmatprep.subr.bf16.mxu0 %v1605_v2 }
 0x1a4   :  { %v309_v56 = vpop.permute.xlu1 %308 }
 0x1a5   :  { %v341_v57 = vsel %vm340_vm15, %v309_v56, %v311_v55 }
 0x1a6   :  { %1440 = vmatprep.subr.bf16.mxu1 %v341_v57 }
 0x1a7   :  { %v364_v58 = vpop.permute.xlu0 %363  ;;  %1441 = vmatpush3.bf16.msra.mxu1 %v1902_v22 }
 0x1a8   :  { %v362_v59 = vpop.permute.xlu1 %361  ;;  %1535 = vmatprep.subr.bf16.mxu1 %v1605_v2 }
 0x1a9   :  { %v375_v60 = vsel %vm373_vm13, %v362_v59, %v364_v58 }
 0x1aa   :  { %454 = vmatmul.mubr.bf16.vlgmr.msra.gmra.mxu1 %v1870_v7  ;;  %1522 = vmatpush3.bf16.msra.mxu0 %v375_v60 }
 0x1ab   :  { %v360_v63 = vpop.permute.xlu0 %359  ;;  %1523 = vmatprep.subr.bf16.mxu0 %v1605_v2  ;;  %1543 = vmatprep.mubr.msk.bf16.mxu1 %vm1606_vm1, %v1605_v2 }
 0x1ac   :  { %v358_v0 = vpop.permute.xlu1 %357 }
 0x1ad   :  { %v374_v4 = vsel %vm373_vm13, %v358_v0, %v360_v63 }
 0x1ae   :  { %1524 = vmatpush3.bf16.msra.mxu0 %v374_v4 }
 0x1af   :  { %1529 = vmatprep.subr.bf16.mxu0 %v1605_v2  ;;  %v393_v9 = vpop.permute.xlu0 %392 }
 0x1b0   :  { %v387_v7 = vpop.permute.xlu1 %386 }
 0x1b1   :  { %1526 = vmatmul.mubr.msk.bf16.vlgmr.msra.gmra.mxu0 %vm414_vm12, %v410_v1  ;;  %v388_v8 = vadd.f32 %v387_v7, %v1910_v24 }
 0x1b2   :  { %1531 = vmatprep.mubr.msk.bf16.mxu0 %vm1606_vm1, %v1605_v2 }
 0x1b3   :  { %v394_v12 = vadd.f32 %v393_v9, %v388_v8 }
 0x26a   :  { %v1442_v10 = vpop.f32.mrf.mxu1 }
 0x26c   :  { %v1443_v11 = vpop.f32.mrf.mxu1 }
 0x26d   :  { %v1444_v13 = vadd.f32 %v1443_v11, %v1442_v10 }
 0x26e   :  { %v1445_v14 = vpop.f32.mrf.mxu1 }
 0x26f   :  { %v456_v15 = vadd.f32 %v1444_v13, %v394_v12 }
 0x270   :  { %v1446_v16 = vpop.f32.mrf.mxu1 }
 0x271   :  { %v495_v17 = vpop.f32.mrf.mxu0 }
 0x272   :  { %v496_v19 = vadd.f32 %v495_v17, %v456_v15 }
 0x273   :  { %v1527_v21 = vpop.f32.mrf.mxu0 }
 0x274   :  { %v503_v22 = vsel %vm65_vm14, %v496_v19, 0.0 }
 0x275   :  { %v498_v25 = vpop.f32.mrf.mxu0  ;;  %v504_v5 = vsel %vm237_vm7, %v503_v22, 0.0  ;;  %v508_v24 = vmul.f32 %v503_v22, %v503_v22 }
 0x276   :  { %505 = vadd.xlane.f32.xlu1 %v504_v5 }
 0x277   :  { %v1528_v27 = vpop.f32.mrf.mxu0  ;;  %v509_v28 = vsel %vm237_vm7, %v508_v24, 0.0 }
 0x278   :  { %510 = vadd.xlane.f32.xlu0 %v509_v28 }
 0x287   :  { %528 = vperm.xlu1 %1589, %v133_v29  }
 0x28e   :  { %522 = vperm.xlu0 %1588, %v132_v30  }
 0x2ff   :  { %v506_v32 = vpop.xlane.xlu1 %505 }
 0x300   :  { %v507_v33 = vmul.f32 0.020833334, %v506_v32 }
 0x301   :  { %v511_v34 = vpop.xlane.xlu0 %510 }
 0x302   :  { %v513_v20 = vmul.f32 %v507_v33, %v507_v33  ;;  %v512_v35 = vmul.f32 0.020833334, %v511_v34  ;;  %v516_v40 = vsub.f32 %v496_v19, %v507_v33 }
 0x303   :  { %v529_v45 = vpop.permute.xlu1 %528 }
 0x304   :  { %v514_v36 = vsub.f32 %v512_v35, %v513_v20 }
 0x306   :  { %v515_v38 = vmax.f32 %v514_v36, 0.0 }
 0x308   :  { %v517_v39 = vadd.f32 1e-05, %v515_v38 }
 0x309   :  { %v523_v42 = vpop.permute.xlu0 %522 }
 0x30a   :  { %1596 = vrsqrt.f32 %v517_v39 }
 0x317   :  { %v1597_v41 = vpop.eup %1596 }
 0x318   :  { %v519_v44 = vmul.f32 %v1597_v41, %v516_v40 }
 0x31a   :  { %v525_v46 = vmul.f32 %v523_v42, %v519_v44 }
 0x31c   :  { %v531_v31 = vadd.f32 %v529_v45, %v525_v46 }
 0x31e   :  { %v532_v47 = vmax.f32 %v531_v31, 0.0 }
 0x320   :  { %v533_v48 = vsel %vm65_vm14, %v532_v47, 0.0 }
 0x321   :  { %v534_v37 = vpack.c.bf16 %v533_v48, %v533_v48 }
 0x323   :  { %v540_v50 = vsel %vm78_vm0, %v534_v37, 0 }
 0x324   :  { %588 = vrot.lane.b32.xlu1 %v540_v50, %s1604_s21  ;;  %1530 = vmatpush3.bf16.msra.mxu0 %v540_v50 }
 0x327   :  { %1532 = vmatmul.mubr.msk.bf16.vlgmr.msra.gmra.mxu0 %vm74_vm2, %v535_v51 }
 0x396   :  { %v589_v43 = vpop.permute.xlu1 %588 }
 0x397   :  { %v1986_v52 = vsel %vm139_vm3, 0, %v589_v43  ;;  %v1993_v53 = vsel %vm139_vm3, %v589_v43, 0  ;;  %v2092_v43 = vld [vmem:[%s2424_s8] sm:$0x3f] }
 0x398   :  { %642 = vrot.lane.b32.xlu0 %v1986_v52, %s1609_s25  ;;  %662 = vrot.lane.b32.xlu1 %v1986_v52, %s1607_s23  ;;  %v595_v49 = vrot.slane %v1986_v52, 4  ;;  %v596_v54 = vrot.slane %v1993_v53, 4 }
 0x39c   :  { %632 = vrot.lane.b32.xlu0 %v1986_v52, %s1610_s1  ;;  %664 = vrot.lane.b32.xlu1 %v1993_v53, %s1607_s23 }
 0x3a0   :  { %622 = vrot.lane.b32.xlu0 %v1986_v52, %s1611_s26  ;;  %652 = vrot.lane.b32.xlu1 %v1986_v52, %s1608_s24 }
 0x3a4   :  { %612 = vrot.lane.b32.xlu0 %v1986_v52, %s1612_s27  ;;  %654 = vrot.lane.b32.xlu1 %v1993_v53, %s1608_s24 }
 0x3a8   :  { %602 = vrot.lane.b32.xlu0 %v1986_v52, %s2466_s28  ;;  %644 = vrot.lane.b32.xlu1 %v1993_v53, %s1609_s25 }
 0x3ac   :  { %634 = vrot.lane.b32.xlu1 %v1993_v53, %s1610_s1  ;;  %657 = vrot.lane.b32.xlu0 %v595_v49, %s2464_s0 }
 0x3b0   :  { %624 = vrot.lane.b32.xlu1 %v1993_v53, %s1611_s26  ;;  %647 = vrot.lane.b32.xlu0 %v595_v49, %s2478_s9 }
 0x3b4   :  { %614 = vrot.lane.b32.xlu1 %v1993_v53, %s1612_s27  ;;  %637 = vrot.lane.b32.xlu0 %v595_v49, %s2479_s4 }
 0x3b8   :  { %604 = vrot.lane.b32.xlu1 %v1993_v53, %s2466_s28  ;;  %627 = vrot.lane.b32.xlu0 %v595_v49, %s2480_s30 }
 0x3bc   :  { %617 = vrot.lane.b32.xlu0 %v595_v49, %s2481_s20  ;;  %667 = vrot.lane.b32.xlu1 %v595_v49, %s2482_s5 }
 0x3c0   :  { %607 = vrot.lane.b32.xlu0 %v595_v49, %s2483_s6  ;;  %669 = vrot.lane.b32.xlu1 %v596_v54, %s2482_s5 }
 0x3c4   :  { %597 = vrot.lane.b32.xlu0 %v595_v49, %s1621_s29  ;;  %659 = vrot.lane.b32.xlu1 %v596_v54, %s2464_s0 }
 0x3c8   :  { %649 = vrot.lane.b32.xlu1 %v596_v54, %s2478_s9 }
 0x3cc   :  { %639 = vrot.lane.b32.xlu1 %v596_v54, %s2479_s4 }
 0x3d0   :  { %629 = vrot.lane.b32.xlu1 %v596_v54, %s2480_s30 }
 0x3d4   :  { %619 = vrot.lane.b32.xlu1 %v596_v54, %s2481_s20 }
 0x3d8   :  { %609 = vrot.lane.b32.xlu1 %v596_v54, %s2483_s6 }
 0x3dc   :  { %599 = vrot.lane.b32.xlu1 %v596_v54, %s1621_s29  ;;  %v2100_v54 = vrot.slane %v2092_v43, %v1851_v62 }
 0x3e7   :  { %v2040_v9 = vpop.f32.mrf.mxu0 }
 0x3e9   :  { %v1533_v10 = vpop.f32.mrf.mxu0 }
 0x3eb   :  { %v579_v12 = vpop.f32.mrf.mxu0 }
 0x3ed   :  { %v1534_v14 = vpop.f32.mrf.mxu0 }
 0x40a   :  { %v663_v55 = vpop.permute.xlu1 %662  ;;  %v643_v56 = vpop.permute.xlu0 %642 }
 0x40e   :  { %v665_v57 = vpop.permute.xlu1 %664  ;;  %v633_v59 = vpop.permute.xlu0 %632 }
 0x40f   :  { %v666_v19 = vsel %vm229_vm5, %v663_v55, %v665_v57 }
 0x412   :  { %v653_v58 = vpop.permute.xlu1 %652  ;;  %v623_v61 = vpop.permute.xlu0 %622 }
 0x416   :  { %v655_v60 = vpop.permute.xlu1 %654  ;;  %v613_v1 = vpop.permute.xlu0 %612 }
 0x417   :  { %v656_v24 = vsel %vm2462_vm8, %v653_v58, %v655_v60  ;;  %vm2486_vm8 = vcmask 900096  }
 0x41a   :  { %v645_v63 = vpop.permute.xlu1 %644  ;;  %v603_v7 = vpop.permute.xlu0 %602 }
 0x41b   :  { %v646_v33 = vsel %vm205_vm10, %v643_v56, %v645_v63 }
 0x41e   :  { %v635_v0 = vpop.permute.xlu1 %634  ;;  %v658_v13 = vpop.permute.xlu0 %657 }
 0x422   :  { %v625_v4 = vpop.permute.xlu1 %624  ;;  %v648_v16 = vpop.permute.xlu0 %647 }
 0x423   :  { %804 = vrot.lane.b32.xlu1 %v625_v4, %s2468_s22  ;;  %v626_v3 = vsel %vm181_vm4, %v623_v61, %v625_v4 }
 0x424   :  { %802 = vrot.lane.b32.xlu0 %v626_v3, %s2468_s22 }
 0x426   :  { %v615_v8 = vpop.permute.xlu1 %614  ;;  %v638_v29 = vpop.permute.xlu0 %637 }
 0x42a   :  { %v605_v11 = vpop.permute.xlu1 %604  ;;  %v628_v36 = vpop.permute.xlu0 %627 }
 0x42e   :  { %v668_v15 = vpop.permute.xlu1 %667  ;;  %v618_v31 = vpop.permute.xlu0 %617 }
 0x432   :  { %v670_v17 = vpop.permute.xlu1 %669  ;;  %v608_v55 = vpop.permute.xlu0 %607 }
 0x433   :  { %v671_v21 = vsel %vm235_vm6, %v668_v15, %v670_v17  ;;  %v725_v22 = vsel %vm237_vm7, %v665_v57, %v670_v17  ;;  %v841_v57 = vcombine.high %v2100_v54, %v2100_v54 }
 0x434   :  { %772 = vrot.lane.b32.xlu1 %v725_v22, %s2484_s7  ;;  %v2047_v25 = vsel %vm237_vm7, %v666_v19, %v671_v21 }
 0x435   :  { %770 = vrot.lane.b32.xlu0 %v2047_v25, %s2484_s7  ;;  %882 = vmatprep.mubr.bf16.mxu0 %v841_v57 }
 0x436   :  { %v660_v5 = vpop.permute.xlu1 %659 }
 0x437   :  { %v661_v27 = vsel %vm2461_vm9, %v658_v13, %v660_v5  ;;  %v722_v28 = vsel %vm237_vm7, %v655_v60, %v660_v5  ;;  %vm2485_vm9 = vcmask 916480  }
 0x438   :  { %768 = vrot.lane.b32.xlu1 %v722_v28, %s2484_s7  ;;  %v2056_v30 = vsel %vm237_vm7, %v656_v24, %v661_v27  ;;  %v636_v39 = vsel %vm2485_vm9, %v633_v59, %v635_v0  ;;  %vm2489_vm9 = vcmask 965632  }
 0x439   :  { %766 = vrot.lane.b32.xlu0 %v2056_v30, %s2484_s7 }
 0x43a   :  { %v650_v32 = vpop.permute.xlu1 %649 }
 0x43b   :  { %v651_v34 = vsel %vm2463_vm11, %v648_v16, %v650_v32  ;;  %v719_v20 = vsel %vm237_vm7, %v645_v63, %v650_v32  ;;  %vm2487_vm11 = vcmask 932864  }
 0x43c   :  { %764 = vrot.lane.b32.xlu1 %v719_v20, %s2484_s7  ;;  %v2065_v35 = vsel %vm237_vm7, %v646_v33, %v651_v34 }
 0x43d   :  { %762 = vrot.lane.b32.xlu0 %v2065_v35, %s2484_s7 }
 0x43e   :  { %v640_v38 = vpop.permute.xlu1 %639 }
 0x43f   :  { %v641_v40 = vsel %vm2486_vm8, %v638_v29, %v640_v38  ;;  %v716_v41 = vsel %vm237_vm7, %v635_v0, %v640_v38  ;;  %vm2488_vm8 = vcmask 982016   ;;  %v598_v0 = vpop.permute.xlu0 %597 }
 0x440   :  { %760 = vrot.lane.b32.xlu1 %v716_v41, %s2484_s7  ;;  %v2074_v42 = vsel %vm237_vm7, %v636_v39, %v641_v40  ;;  %v616_v37 = vsel %vm2488_vm8, %v613_v1, %v615_v8  ;;  %vm2491_vm8 = vcmask 998400  }
 0x441   :  { %758 = vrot.lane.b32.xlu0 %v2074_v42, %s2484_s7 }
 0x442   :  { %v630_v44 = vpop.permute.xlu1 %629 }
 0x443   :  { %v631_v45 = vsel %vm2487_vm11, %v628_v36, %v630_v44  ;;  %v713_v46 = vsel %vm237_vm7, %v625_v4, %v630_v44  ;;  %vm2490_vm11 = vcmask 1014784  }
 0x444   :  { %756 = vrot.lane.b32.xlu1 %v713_v46, %s2484_s7  ;;  %v2082_v47 = vsel %vm237_vm7, %v626_v3, %v631_v45  ;;  %v606_v58 = vsel %vm2490_vm11, %v603_v7, %v605_v11  ;;  %v582_v3 = vld [vmem:[%s2425_s2] sm:$0xf]  ;;  %s2493_s2 = smov 2  }
 0x445   :  { %754 = vrot.lane.b32.xlu0 %v2082_v47, %s2484_s7  ;;  %vm813_vm11 = vcmp.eq.s32.totalorder %v582_v3, %v1892_v18 }
 0x446   :  { %v620_v48 = vpop.permute.xlu1 %619 }
 0x447   :  { %v621_v50 = vsel %vm2489_vm9, %v618_v31, %v620_v48  ;;  %v710_v51 = vsel %vm237_vm7, %v615_v8, %v620_v48  ;;  %vm2492_vm9 = vcmask 1031168   ;;  %v2133_v8 = vsel %vm813_vm11, %v2040_v9, 0.0 }
 0x448   :  { %752 = vrot.lane.b32.xlu1 %v710_v51, %s2484_s7  ;;  %v2096_v49 = vsel %vm237_vm7, %v616_v37, %v621_v50  ;;  %vm2505_vm11 = vcmask 1014784  }
 0x449   :  { %750 = vrot.lane.b32.xlu0 %v2096_v49, %s2484_s7 }
 0x44a   :  { %v610_v56 = vpop.permute.xlu1 %609 }
 0x44b   :  { %v611_v59 = vsel %vm2491_vm8, %v608_v55, %v610_v56  ;;  %v707_v60 = vsel %vm237_vm7, %v605_v11, %v610_v56  ;;  %vm820_vm8 = vcmp.eq.s32.totalorder %v582_v3, %v1913_v6 }
 0x44c   :  { %748 = vrot.lane.b32.xlu1 %v707_v60, %s2484_s7  ;;  %v2111_v61 = vsel %vm237_vm7, %v606_v58, %v611_v59 }
 0x44d   :  { %746 = vrot.lane.b32.xlu0 %v2111_v61, %s2484_s7 }
 0x44e   :  { %v600_v63 = vpop.permute.xlu1 %599 }
 0x44f   :  { %v601_v1 = vsel %vm2492_vm9, %v598_v0, %v600_v63  ;;  %v704_v4 = vsel %vm237_vm7, %v1993_v53, %v600_v63  ;;  %vm815_vm9 = vcmp.eq.s32.totalorder %v582_v3, %v1916_v26 }
 0x450   :  { %800 = vrot.lane.b32.xlu1 %v710_v51, %s2468_s22  ;;  %v2127_v7 = vsel %vm237_vm7, %v1986_v52, %v601_v1  ;;  %v821_v52 = vsel %vm820_vm8, %v2040_v9, 0.0  ;;  %v816_v53 = vsel %vm815_vm9, %v2040_v9, 0.0  ;;  %vm2506_vm8 = vcmask 998400  }
 0x451   :  { %798 = vrot.lane.b32.xlu0 %v2096_v49, %s2468_s22  ;;  %vm2507_vm9 = vcmask 1031168  }
 0x454   :  { %744 = vrot.lane.b32.xlu1 %v704_v4, %s2484_s7 }
 0x455   :  { %742 = vrot.lane.b32.xlu0 %v2127_v7, %s2484_s7 }
 0x458   :  { %796 = vrot.lane.b32.xlu1 %v707_v60, %s2468_s22 }
 0x459   :  { %794 = vrot.lane.b32.xlu0 %v2111_v61, %s2468_s22 }
 0x45c   :  { %792 = vrot.lane.b32.xlu1 %v704_v4, %s2468_s22 }
 0x45d   :  { %790 = vrot.lane.b32.xlu0 %v2127_v7, %s2468_s22 }
 0x460   :  { %822 = vrot.lane.b32.xlu1 %v821_v52, %s1621_s29 }
 0x461   :  { %817 = vrot.lane.b32.xlu0 %v816_v53, %s2493_s2  ;;  %v585_v53 = vld [vmem:[%s2426_s11] sm:$0xf] }
 0x495   :  { %v805_v10 = vpop.permute.xlu1 %804 }
 0x496   :  { %v803_v11 = vpop.permute.xlu0 %802 }
 0x497   :  { %v809_v12 = vsel %vm373_vm13, %v803_v11, %v805_v10  ;;  %v584_v10 = vld [vmem:[%s2427_s10] sm:$0xf] }
 0x498   :  { %v848_v13 = vsel %vm237_vm7, %v809_v12, 0 }
 0x499   :  { %1536 = vmatpush3.bf16.msra.mxu1 %v848_v13 }
 0x49a   :  { %1537 = vmatprep.subr.bf16.mxu1 %v1605_v2 }
 0x4a6   :  { %v773_v14 = vpop.permute.xlu1 %772 }
 0x4a7   :  { %v771_v15 = vpop.permute.xlu0 %770 }
 0x4a8   :  { %v781_v16 = vsel %vm340_vm15, %v771_v15, %v773_v14 }
 0x4a9   :  { %1455 = vmatprep.subr.bf16.mxu0 %v781_v16 }
 0x4aa   :  { %v769_v17 = vpop.permute.xlu1 %768  ;;  %1456 = vmatpush3.bf16.msra.mxu0 %v2047_v25 }
 0x4ab   :  { %v767_v9 = vpop.permute.xlu0 %766 }
 0x4ac   :  { %v780_v19 = vsel %vm340_vm15, %v767_v9, %v769_v17 }
 0x4ad   :  { %1457 = vmatprep.subr.bf16.mxu0 %v780_v19 }
 0x4ae   :  { %v765_v21 = vpop.permute.xlu1 %764  ;;  %1458 = vmatpush3.bf16.msra.mxu0 %v2056_v30 }
 0x4af   :  { %v763_v22 = vpop.permute.xlu0 %762 }
 0x4b0   :  { %v779_v5 = vsel %vm340_vm15, %v763_v22, %v765_v21 }
 0x4b1   :  { %1459 = vmatprep.subr.bf16.mxu0 %v779_v5 }
 0x4b2   :  { %v761_v24 = vpop.permute.xlu1 %760  ;;  %1460 = vmatpush3.bf16.msra.mxu0 %v2065_v35 }
 0x4b3   :  { %v759_v27 = vpop.permute.xlu0 %758 }
 0x4b4   :  { %v778_v28 = vsel %vm340_vm15, %v759_v27, %v761_v24 }
 0x4b5   :  { %1461 = vmatprep.subr.bf16.mxu0 %v778_v28 }
 0x4b6   :  { %v757_v29 = vpop.permute.xlu1 %756  ;;  %1462 = vmatpush3.bf16.msra.mxu0 %v2074_v42 }
 0x4b7   :  { %v755_v25 = vpop.permute.xlu0 %754 }
 0x4b8   :  { %v777_v32 = vsel %vm340_vm15, %v755_v25, %v757_v29 }
 0x4b9   :  { %1463 = vmatprep.subr.bf16.mxu0 %v777_v32 }
 0x4ba   :  { %v753_v33 = vpop.permute.xlu1 %752  ;;  %1464 = vmatpush3.bf16.msra.mxu0 %v2082_v47  ;;  %v826_v47 = vcombine.high %v2092_v43, %v2092_v43 }
 0x4bb   :  { %v751_v30 = vpop.permute.xlu0 %750 }
 0x4bc   :  { %v776_v34 = vsel %vm340_vm15, %v751_v30, %v753_v33  ;;  %v840_v50 = vrot.slane %v826_v47, %v1851_v62  ;;  %v962_v30 = vld [vmem:[%s2428_s13] sm:$0xf]  ;;  %s2494_s13 = smov 124  }
 0x4bd   :  { %1465 = vmatprep.subr.bf16.mxu0 %v776_v34 }
 0x4be   :  { %v749_v20 = vpop.permute.xlu1 %748  ;;  %1466 = vmatpush3.bf16.msra.mxu0 %v2096_v49 }
 0x4bf   :  { %v747_v35 = vpop.permute.xlu0 %746 }
 0x4c0   :  { %v775_v36 = vsel %vm340_vm15, %v747_v35, %v749_v20 }
 0x4c1   :  { %1467 = vmatprep.subr.bf16.mxu0 %v775_v36 }
 0x4c2   :  { %v801_v38 = vpop.permute.xlu1 %800  ;;  %1468 = vmatpush3.bf16.msra.mxu0 %v2111_v61 }
 0x4c3   :  { %v799_v39 = vpop.permute.xlu0 %798 }
 0x4c4   :  { %v808_v40 = vsel %vm373_vm13, %v799_v39, %v801_v38 }
 0x4c5   :  { %1538 = vmatpush3.bf16.msra.mxu1 %v808_v40 }
 0x4c6   :  { %v745_v41 = vpop.permute.xlu1 %744  ;;  %1539 = vmatprep.subr.bf16.mxu1 %v1605_v2 }
 0x4c7   :  { %v743_v42 = vpop.permute.xlu0 %742 }
 0x4c8   :  { %v774_v44 = vsel %vm340_vm15, %v743_v42, %v745_v41 }
 0x4c9   :  { %1469 = vmatprep.subr.bf16.mxu0 %v774_v44 }
 0x4ca   :  { %v797_v45 = vpop.permute.xlu1 %796  ;;  %1470 = vmatpush3.bf16.msra.mxu0 %v2127_v7 }
 0x4cb   :  { %v795_v46 = vpop.permute.xlu0 %794  ;;  %1547 = vmatprep.subr.bf16.mxu0 %v1605_v2 }
 0x4cc   :  { %v807_v31 = vsel %vm373_vm13, %v795_v46, %v797_v45 }
 0x4cd   :  { %883 = vmatmul.mubr.bf16.vlgmr.msra.gmra.mxu0 %v2100_v54  ;;  %1540 = vmatpush3.bf16.msra.mxu1 %v807_v31 }
 0x4ce   :  { %v793_v48 = vpop.permute.xlu1 %792  ;;  %1541 = vmatprep.subr.bf16.mxu1 %v1605_v2  ;;  %1549 = vmatprep.mubr.msk.bf16.mxu0 %vm1606_vm1, %v1605_v2 }
 0x4cf   :  { %v791_v37 = vpop.permute.xlu0 %790 }
 0x4d0   :  { %v806_v51 = vsel %vm373_vm13, %v791_v37, %v793_v48 }
 0x4d1   :  { %1542 = vmatpush3.bf16.msra.mxu1 %v806_v51 }
 0x4d2   :  { %v823_v55 = vpop.permute.xlu1 %822 }
 0x4d3   :  { %v818_v49 = vpop.permute.xlu0 %817 }
 0x4d4   :  { %1544 = vmatmul.mubr.msk.bf16.vlgmr.msra.gmra.mxu1 %vm414_vm12, %v840_v50  ;;  %v819_v43 = vadd.f32 %v818_v49, %v2133_v8 }
 0x4d6   :  { %v824_v57 = vadd.f32 %v823_v55, %v819_v43 }
 0x58d   :  { %v1471_v54 = vpop.f32.mrf.mxu0 }
 0x58f   :  { %v1472_v56 = vpop.f32.mrf.mxu0 }
 0x590   :  { %v1473_v58 = vadd.f32 %v1472_v56, %v1471_v54 }
 0x591   :  { %v1474_v59 = vpop.f32.mrf.mxu0 }
 0x592   :  { %v885_v60 = vadd.f32 %v1473_v58, %v824_v57 }
 0x593   :  { %v1475_v61 = vpop.f32.mrf.mxu0 }
 0x594   :  { %v924_v63 = vpop.f32.mrf.mxu1 }
 0x595   :  { %v925_v0 = vadd.f32 %v924_v63, %v885_v60 }
 0x596   :  { %v1545_v1 = vpop.f32.mrf.mxu1 }
 0x597   :  { %v930_v62 = vsel %vm65_vm14, %v925_v0, 0.0 }
 0x598   :  { %v935_v4 = vmul.f32 %v930_v62, %v930_v62  ;;  %v927_v3 = vpop.f32.mrf.mxu1  ;;  %v931_v7 = vsel %vm237_vm7, %v930_v62, 0.0 }
 0x599   :  { %932 = vadd.xlane.f32.xlu0 %v931_v7 }
 0x59a   :  { %v1546_v8 = vpop.f32.mrf.mxu1  ;;  %v936_v52 = vsel %vm237_vm7, %v935_v4, 0.0 }
 0x59b   :  { %937 = vadd.xlane.f32.xlu1 %v936_v52 }
 0x5ac   :  { %955 = vperm.xlu1 %1589, %v585_v53  }
 0x5af   :  { %949 = vperm.xlu0 %1588, %v584_v10  }
 0x622   :  { %v933_v11 = vpop.xlane.xlu0 %932 }
 0x623   :  { %v934_v12 = vmul.f32 0.020833334, %v933_v11 }
 0x624   :  { %v938_v13 = vpop.xlane.xlu1 %937 }
 0x625   :  { %v940_v14 = vmul.f32 %v934_v12, %v934_v12  ;;  %v939_v15 = vmul.f32 0.020833334, %v938_v13  ;;  %v943_v19 = vsub.f32 %v925_v0, %v934_v12 }
 0x627   :  { %v941_v16 = vsub.f32 %v939_v15, %v940_v14 }
 0x628   :  { %v956_v27 = vpop.permute.xlu1 %955 }
 0x629   :  { %v942_v17 = vmax.f32 %v941_v16, 0.0 }
 0x62a   :  { %v950_v5 = vpop.permute.xlu0 %949 }
 0x62b   :  { %v944_v9 = vadd.f32 1e-05, %v942_v17 }
 0x62d   :  { %1598 = vrsqrt.f32 %v944_v9 }
 0x63a   :  { %v1599_v21 = vpop.eup %1598 }
 0x63b   :  { %v946_v22 = vmul.f32 %v1599_v21, %v943_v19 }
 0x63d   :  { %v952_v24 = vmul.f32 %v950_v5, %v946_v22 }
 0x63f   :  { %v958_v28 = vadd.f32 %v956_v27, %v952_v24 }
 0x641   :  { %v959_v29 = vmax.f32 %v958_v28, 0.0 }
 0x643   :  { %v960_v25 = vsel %vm65_vm14, %v959_v29, 0.0 }
 0x644   :  { %v961_v32 = vpack.c.bf16 %v960_v25, %v960_v25 }
 0x646   :  { %v967_v33 = vsel %vm78_vm0, %v961_v32, 0  ;;  %vm2497_vm0 = vcmask 850944  }
 0x647   :  { %1016 = vrot.lane.b32.xlu0 %v967_v33, %s1604_s21  ;;  %1548 = vmatpush3.bf16.msra.mxu0 %v967_v33  ;;  %s2495_s21 = smov 102  }
 0x648   :  { %1553 = vmatprep.subr.bf16.mxu0 %v1605_v2 }
 0x64a   :  { %1550 = vmatmul.mubr.msk.bf16.vlgmr.msra.gmra.mxu0 %vm74_vm2, %v962_v30  ;;  %vm2499_vm2 = vcmask 867328  }
 0x64b   :  { %1561 = vmatprep.mubr.msk.bf16.mxu0 %vm1606_vm1, %v1605_v2  ;;  %vm2498_vm1 = vcmask 834560  }
 0x6b9   :  { %v1017_v34 = vpop.permute.xlu0 %1016 }
 0x6ba   :  { %v2202_v20 = vsel %vm139_vm3, 0, %v1017_v34  ;;  %v2205_v35 = vsel %vm139_vm3, %v1017_v34, 0  ;;  %vm2500_vm3 = vcmask 916480   ;;  %v2314_v34 = vld [vmem:[%s2429_s12] sm:$0xff] }
 0x6bb   :  { %1092 = vrot.lane.b32.xlu0 %v2205_v35, %s1607_s23  ;;  %1090 = vrot.lane.b32.xlu1 %v2202_v20, %s1607_s23  ;;  %v1023_v36 = vrot.slane %v2202_v20, 4  ;;  %v1024_v38 = vrot.slane %v2205_v35, 4  ;;  %s2496_s23 = smov 64  }
 0x6bf   :  { %1082 = vrot.lane.b32.xlu0 %v2205_v35, %s1608_s24  ;;  %1080 = vrot.lane.b32.xlu1 %v2202_v20, %s1608_s24 }
 0x6c3   :  { %1072 = vrot.lane.b32.xlu0 %v2205_v35, %s1609_s25  ;;  %1070 = vrot.lane.b32.xlu1 %v2202_v20, %s1609_s25 }
 0x6c7   :  { %1062 = vrot.lane.b32.xlu0 %v2205_v35, %s1610_s1  ;;  %1060 = vrot.lane.b32.xlu1 %v2202_v20, %s1610_s1 }
 0x6cb   :  { %1052 = vrot.lane.b32.xlu0 %v2205_v35, %s1611_s26  ;;  %1050 = vrot.lane.b32.xlu1 %v2202_v20, %s1611_s26 }
 0x6cf   :  { %1042 = vrot.lane.b32.xlu0 %v2205_v35, %s1612_s27  ;;  %1040 = vrot.lane.b32.xlu1 %v2202_v20, %s1612_s27 }
 0x6d3   :  { %1032 = vrot.lane.b32.xlu0 %v2205_v35, %s2494_s13  ;;  %1030 = vrot.lane.b32.xlu1 %v2202_v20, %s2494_s13 }
 0x6d7   :  { %1097 = vrot.lane.b32.xlu0 %v1024_v38, %s2482_s5  ;;  %1095 = vrot.lane.b32.xlu1 %v1023_v36, %s2482_s5 }
 0x6db   :  { %1087 = vrot.lane.b32.xlu0 %v1024_v38, %s2495_s21  ;;  %1085 = vrot.lane.b32.xlu1 %v1023_v36, %s2495_s21 }
 0x6df   :  { %1077 = vrot.lane.b32.xlu0 %v1024_v38, %s2478_s9  ;;  %1075 = vrot.lane.b32.xlu1 %v1023_v36, %s2478_s9 }
 0x6e3   :  { %1067 = vrot.lane.b32.xlu0 %v1024_v38, %s2479_s4  ;;  %1065 = vrot.lane.b32.xlu1 %v1023_v36, %s2479_s4 }
 0x6e7   :  { %1057 = vrot.lane.b32.xlu0 %v1024_v38, %s2480_s30  ;;  %1055 = vrot.lane.b32.xlu1 %v1023_v36, %s2480_s30 }
 0x6eb   :  { %1047 = vrot.lane.b32.xlu0 %v1024_v38, %s2481_s20  ;;  %1045 = vrot.lane.b32.xlu1 %v1023_v36, %s2481_s20 }
 0x6ef   :  { %1037 = vrot.lane.b32.xlu0 %v1024_v38, %s2483_s6  ;;  %1035 = vrot.lane.b32.xlu1 %v1023_v36, %s2483_s6 }
 0x6f3   :  { %1027 = vrot.lane.b32.xlu0 %v1024_v38, %s1621_s29  ;;  %1025 = vrot.lane.b32.xlu1 %v1023_v36, %s1621_s29 }
 0x70a   :  { %v2253_v39 = vpop.f32.mrf.mxu0 }
 0x70c   :  { %v1551_v40 = vpop.f32.mrf.mxu0 }
 0x70d   :  { %v1421_v40 = vcombine.high %v2314_v34, %v2314_v34 }
 0x70e   :  { %v1006_v41 = vpop.f32.mrf.mxu0 }
 0x70f   :  { %1301 = vmatprep.mubr.bf16.mxu1 %v1421_v40 }
 0x710   :  { %v1552_v42 = vpop.f32.mrf.mxu0 }
 0x72d   :  { %v1093_v44 = vpop.permute.xlu0 %1092  ;;  %v1091_v45 = vpop.permute.xlu1 %1090 }
 0x72e   :  { %v1094_v60 = vsel %vm229_vm5, %v1091_v45, %v1093_v44  ;;  %vm2502_vm5 = vcmask 932864  }
 0x731   :  { %v1083_v46 = vpop.permute.xlu0 %1082  ;;  %v1081_v31 = vpop.permute.xlu1 %1080 }
 0x732   :  { %v1084_v4 = vsel %vm2497_vm0, %v1081_v31, %v1083_v46 }
 0x735   :  { %v1073_v47 = vpop.permute.xlu0 %1072  ;;  %v1071_v48 = vpop.permute.xlu1 %1070 }
 0x736   :  { %v1074_v10 = vsel %vm205_vm10, %v1071_v48, %v1073_v47  ;;  %vm2504_vm10 = vcmask 965632  }
 0x739   :  { %v1063_v37 = vpop.permute.xlu0 %1062  ;;  %v1061_v50 = vpop.permute.xlu1 %1060 }
 0x73a   :  { %v1064_v16 = vsel %vm2500_vm3, %v1061_v50, %v1063_v37  ;;  %v2344_v50 = vld [vmem:[%s2430_s3] sm:$0xff] }
 0x73b   :  { %vm1248_vm0 = vcmp.eq.s32.totalorder %v2344_v50, %v1913_v6  ;;  %v123_v6 = vld [vmem:[%s2431_s16] sm:$0xff] }
 0x73d   :  { %v1053_v51 = vpop.permute.xlu0 %1052  ;;  %v1051_v49 = vpop.permute.xlu1 %1050 }
 0x73e   :  { %v1054_v43 = vsel %vm181_vm4, %v1051_v49, %v1053_v51  ;;  %1232 = vrot.lane.b32.xlu0 %v1053_v51, %s2496_s23  ;;  %vm2501_vm4 = vcmask 900096  }
 0x73f   :  { %1230 = vrot.lane.b32.xlu1 %v1054_v43, %s2496_s23 }
 0x741   :  { %v1043_v55 = vpop.permute.xlu0 %1042  ;;  %v1041_v54 = vpop.permute.xlu1 %1040 }
 0x745   :  { %v1033_v56 = vpop.permute.xlu0 %1032  ;;  %v1031_v57 = vpop.permute.xlu1 %1030 }
 0x746   :  { %v1034_v41 = vsel %vm2505_vm11, %v1031_v57, %v1033_v56 }
 0x749   :  { %v1098_v58 = vpop.permute.xlu0 %1097  ;;  %v1096_v59 = vpop.permute.xlu1 %1095 }
 0x74a   :  { %v1153_v61 = vsel %vm237_vm7, %v1093_v44, %v1098_v58  ;;  %v1099_v63 = vsel %vm235_vm6, %v1096_v59, %v1098_v58  ;;  %vm2503_vm6 = vcmask 982016  }
 0x74b   :  { %1200 = vrot.lane.b32.xlu0 %v1153_v61, %s2484_s7  ;;  %v2263_v0 = vsel %vm237_vm7, %v1094_v60, %v1099_v63  ;;  %v1044_v25 = vsel %vm2503_vm6, %v1041_v54, %v1043_v55 }
 0x74c   :  { %1198 = vrot.lane.b32.xlu1 %v2263_v0, %s2484_s7 }
 0x74d   :  { %v1088_v1 = vpop.permute.xlu0 %1087  ;;  %v1086_v62 = vpop.permute.xlu1 %1085 }
 0x74e   :  { %v1150_v3 = vsel %vm237_vm7, %v1083_v46, %v1088_v1  ;;  %v1089_v7 = vsel %vm2498_vm1, %v1086_v62, %v1088_v1  ;;  %vm1243_vm1 = vcmp.eq.s32.totalorder %v2344_v50, %v1916_v26  ;;  %v1012_v26 = vld [vmem:[%s2432_s14] sm:$0xff] }
 0x74f   :  { %1196 = vrot.lane.b32.xlu0 %v1150_v3, %s2484_s7  ;;  %v2272_v8 = vsel %vm237_vm7, %v1084_v4, %v1089_v7 }
 0x750   :  { %1194 = vrot.lane.b32.xlu1 %v2272_v8, %s2484_s7 }
 0x751   :  { %v1078_v52 = vpop.permute.xlu0 %1077  ;;  %v1076_v53 = vpop.permute.xlu1 %1075 }
 0x752   :  { %v1147_v11 = vsel %vm237_vm7, %v1073_v47, %v1078_v52  ;;  %v1079_v12 = vsel %vm2499_vm2, %v1076_v53, %v1078_v52 }
 0x753   :  { %1192 = vrot.lane.b32.xlu0 %v1147_v11, %s2484_s7  ;;  %v2281_v13 = vsel %vm237_vm7, %v1074_v10, %v1079_v12 }
 0x754   :  { %1190 = vrot.lane.b32.xlu1 %v2281_v13, %s2484_s7 }
 0x755   :  { %v1068_v14 = vpop.permute.xlu0 %1067  ;;  %v1066_v15 = vpop.permute.xlu1 %1065 }
 0x756   :  { %v1144_v17 = vsel %vm237_vm7, %v1063_v37, %v1068_v14  ;;  %v1069_v9 = vsel %vm2501_vm4, %v1066_v15, %v1068_v14 }
 0x757   :  { %1188 = vrot.lane.b32.xlu0 %v1144_v17, %s2484_s7  ;;  %v2290_v19 = vsel %vm237_vm7, %v1064_v16, %v1069_v9 }
 0x758   :  { %1186 = vrot.lane.b32.xlu1 %v2290_v19, %s2484_s7 }
 0x759   :  { %v1058_v21 = vpop.permute.xlu0 %1057  ;;  %v1056_v22 = vpop.permute.xlu1 %1055 }
 0x75a   :  { %v1141_v5 = vsel %vm237_vm7, %v1053_v51, %v1058_v21  ;;  %v1059_v24 = vsel %vm2502_vm5, %v1056_v22, %v1058_v21  ;;  %v1378_v51 = vld [vmem:[%s2433_s17] sm:$0xff]  ;;  %v1420_v22 = vcombine.low %v2314_v34, %v2314_v34 }
 0x75b   :  { %1184 = vrot.lane.b32.xlu0 %v1141_v5, %s2484_s7  ;;  %v2298_v27 = vsel %vm237_vm7, %v1054_v43, %v1059_v24 }
 0x75c   :  { %1182 = vrot.lane.b32.xlu1 %v2298_v27, %s2484_s7 }
 0x75d   :  { %v1048_v28 = vpop.permute.xlu0 %1047  ;;  %v1046_v29 = vpop.permute.xlu1 %1045 }
 0x75e   :  { %v1138_v32 = vsel %vm237_vm7, %v1043_v55, %v1048_v28  ;;  %v1049_v33 = vsel %vm2504_vm10, %v1046_v29, %v1048_v28 }
 0x75f   :  { %1180 = vrot.lane.b32.xlu0 %v1138_v32, %s2484_s7  ;;  %v2307_v30 = vsel %vm237_vm7, %v1044_v25, %v1049_v33  ;;  %v1595_v25 = vld [vmem:[%s2429_s12 + $0x8] ss:$0 sps:$4 sm:$0xff]  }
 0x760   :  { %1178 = vrot.lane.b32.xlu1 %v2307_v30, %s2484_s7 }
 0x761   :  { %v1038_v36 = vpop.permute.xlu0 %1037  ;;  %v1036_v38 = vpop.permute.xlu1 %1035 }
 0x762   :  { %v1135_v42 = vsel %vm237_vm7, %v1033_v56, %v1038_v36  ;;  %v1039_v44 = vsel %vm2506_vm8, %v1036_v38, %v1038_v36 }
 0x763   :  { %1176 = vrot.lane.b32.xlu0 %v1135_v42, %s2484_s7  ;;  %v2323_v45 = vsel %vm237_vm7, %v1034_v41, %v1039_v44 }
 0x764   :  { %1174 = vrot.lane.b32.xlu1 %v2323_v45, %s2484_s7 }
 0x765   :  { %v1028_v46 = vpop.permute.xlu0 %1027  ;;  %v1026_v31 = vpop.permute.xlu1 %1025 }
 0x766   :  { %v1029_v47 = vsel %vm2507_vm9, %v1026_v31, %v1028_v46  ;;  %v1132_v48 = vsel %vm237_vm7, %v2205_v35, %v1028_v46  ;;  %v1244_v35 = vsel %vm1243_vm1, %v2253_v39, 0.0 }
 0x767   :  { %1228 = vrot.lane.b32.xlu0 %v1138_v32, %s2496_s23  ;;  %v2336_v37 = vsel %vm237_vm7, %v2202_v20, %v1029_v47  ;;  %v1249_v20 = vsel %vm1248_vm0, %v2253_v39, 0.0 }
 0x768   :  { %1226 = vrot.lane.b32.xlu1 %v2307_v30, %s2496_s23 }
 0x76b   :  { %1172 = vrot.lane.b32.xlu0 %v1132_v48, %s2484_s7 }
 0x76c   :  { %1170 = vrot.lane.b32.xlu1 %v2336_v37, %s2484_s7 }
 0x76f   :  { %1224 = vrot.lane.b32.xlu0 %v1135_v42, %s2496_s23 }
 0x770   :  { %1222 = vrot.lane.b32.xlu1 %v2323_v45, %s2496_s23 }
 0x773   :  { %1220 = vrot.lane.b32.xlu0 %v1132_v48, %s2496_s23 }
 0x774   :  { %1218 = vrot.lane.b32.xlu1 %v2336_v37, %s2496_s23 }
 0x777   :  { %1250 = vrot.lane.b32.xlu0 %v1249_v20, %s1621_s29 }
 0x778   :  { %1245 = vrot.lane.b32.xlu1 %v1244_v35, %s2493_s2 }
 0x77c   :  { %126 = vperm.xlu1 %1589, %v123_v6  }
 0x780   :  { %1366 = vperm.xlu1 %1589, %v1012_v26   ;;  %v1379_v26 = vld [vmem:[%s2434_s18] sm:$0xff] }
 0x784   :  { %1397 = vperm.xlu1 %1589, %v1378_v51   ;;  %v1013_v51 = vld [vmem:[%s2435_s15] sm:$0xff] }
 0x7b0   :  { %v1233_v49 = vpop.permute.xlu0 %1232 }
 0x7b1   :  { %v1231_v43 = vpop.permute.xlu1 %1230 }
 0x7b2   :  { %v1237_v55 = vsel %vm373_vm13, %v1231_v43, %v1233_v49 }
 0x7b3   :  { %v1267_v54 = vsel %vm237_vm7, %v1237_v55, 0  ;;  %vm1241_vm7 = vcmp.eq.s32.totalorder %v2344_v50, %v1892_v18 }
 0x7b4   :  { %1554 = vmatpush3.bf16.msra.mxu0 %v1267_v54 }
 0x7b5   :  { %1555 = vmatprep.subr.bf16.mxu0 %v1605_v2 }
 0x7bd   :  { %v1201_v56 = vpop.permute.xlu0 %1200 }
 0x7be   :  { %v1199_v57 = vpop.permute.xlu1 %1198 }
 0x7bf   :  { %v1209_v58 = vsel %vm340_vm15, %v1199_v57, %v1201_v56 }
 0x7c0   :  { %1484 = vmatprep.subr.bf16.mxu1 %v1209_v58 }
 0x7c1   :  { %v1197_v59 = vpop.permute.xlu0 %1196  ;;  %1485 = vmatpush3.bf16.msra.mxu1 %v2263_v0 }
 0x7c2   :  { %v1195_v60 = vpop.permute.xlu1 %1194 }
 0x7c3   :  { %v1208_v61 = vsel %vm340_vm15, %v1195_v60, %v1197_v59 }
 0x7c4   :  { %1486 = vmatprep.subr.bf16.mxu1 %v1208_v61 }
 0x7c5   :  { %v1193_v63 = vpop.permute.xlu0 %1192  ;;  %1487 = vmatpush3.bf16.msra.mxu1 %v2272_v8 }
 0x7c6   :  { %v1191_v1 = vpop.permute.xlu1 %1190 }
 0x7c7   :  { %v1207_v62 = vsel %vm340_vm15, %v1191_v1, %v1193_v63 }
 0x7c8   :  { %1488 = vmatprep.subr.bf16.mxu1 %v1207_v62 }
 0x7c9   :  { %v1189_v4 = vpop.permute.xlu0 %1188  ;;  %1489 = vmatpush3.bf16.msra.mxu1 %v2281_v13 }
 0x7ca   :  { %v1187_v3 = vpop.permute.xlu1 %1186 }
 0x7cb   :  { %v1206_v7 = vsel %vm340_vm15, %v1187_v3, %v1189_v4 }
 0x7cc   :  { %1490 = vmatprep.subr.bf16.mxu1 %v1206_v7 }
 0x7cd   :  { %v1185_v52 = vpop.permute.xlu0 %1184  ;;  %1491 = vmatpush3.bf16.msra.mxu1 %v2290_v19 }
 0x7ce   :  { %v1183_v0 = vpop.permute.xlu1 %1182 }
 0x7cf   :  { %v1205_v53 = vsel %vm340_vm15, %v1183_v0, %v1185_v52 }
 0x7d0   :  { %1492 = vmatprep.subr.bf16.mxu1 %v1205_v53 }
 0x7d1   :  { %v1181_v10 = vpop.permute.xlu0 %1180  ;;  %1493 = vmatpush3.bf16.msra.mxu1 %v2298_v27 }
 0x7d2   :  { %v1179_v8 = vpop.permute.xlu1 %1178 }
 0x7d3   :  { %v1204_v11 = vsel %vm340_vm15, %v1179_v8, %v1181_v10 }
 0x7d4   :  { %1494 = vmatprep.subr.bf16.mxu1 %v1204_v11 }
 0x7d5   :  { %v1177_v12 = vpop.permute.xlu0 %1176  ;;  %1495 = vmatpush3.bf16.msra.mxu1 %v2307_v30 }
 0x7d6   :  { %v1175_v13 = vpop.permute.xlu1 %1174 }
 0x7d7   :  { %v1203_v14 = vsel %vm340_vm15, %v1175_v13, %v1177_v12 }
 0x7d8   :  { %1496 = vmatprep.subr.bf16.mxu1 %v1203_v14 }
 0x7d9   :  { %v1229_v15 = vpop.permute.xlu0 %1228  ;;  %1497 = vmatpush3.bf16.msra.mxu1 %v2323_v45 }
 0x7da   :  { %v1227_v16 = vpop.permute.xlu1 %1226 }
 0x7db   :  { %v1236_v17 = vsel %vm373_vm13, %v1227_v16, %v1229_v15 }
 0x7dc   :  { %1556 = vmatpush3.bf16.msra.mxu0 %v1236_v17 }
 0x7dd   :  { %v1173_v9 = vpop.permute.xlu0 %1172  ;;  %1557 = vmatprep.subr.bf16.mxu0 %v1605_v2 }
 0x7de   :  { %v1171_v19 = vpop.permute.xlu1 %1170 }
 0x7df   :  { %v1202_v21 = vsel %vm340_vm15, %v1171_v19, %v1173_v9 }
 0x7e0   :  { %1498 = vmatprep.subr.bf16.mxu1 %v1202_v21 }
 0x7e1   :  { %v1225_v5 = vpop.permute.xlu0 %1224  ;;  %1499 = vmatpush3.bf16.msra.mxu1 %v2336_v37 }
 0x7e2   :  { %v1223_v24 = vpop.permute.xlu1 %1222 }
 0x7e3   :  { %v1235_v27 = vsel %vm373_vm13, %v1223_v24, %v1225_v5 }
 0x7e4   :  { %1302 = vmatmul.mubr.bf16.vlgmr.msra.gmra.mxu1 %v1420_v22  ;;  %1558 = vmatpush3.bf16.msra.mxu0 %v1235_v27 }
 0x7e5   :  { %v1221_v28 = vpop.permute.xlu0 %1220  ;;  %1559 = vmatprep.subr.bf16.mxu0 %v1605_v2  ;;  %v1242_v2 = vsel %vm1241_vm7, %v2253_v39, 0.0 }
 0x7e6   :  { %v1219_v29 = vpop.permute.xlu1 %1218 }
 0x7e7   :  { %v1234_v32 = vsel %vm373_vm13, %v1219_v29, %v1221_v28 }
 0x7e8   :  { %1560 = vmatpush3.bf16.msra.mxu0 %v1234_v32 }
 0x7e9   :  { %v1251_v40 = vpop.permute.xlu0 %1250 }
 0x7ea   :  { %v1246_v33 = vpop.permute.xlu1 %1245 }
 0x7eb   :  { %1562 = vmatmul.mubr.msk.bf16.vlgmr.msra.gmra.mxu0 %vm414_vm12, %v1595_v25  ;;  %v1247_v38 = vadd.f32 %v1246_v33, %v1242_v2 }
 0x7ed   :  { %v1252_v44 = vadd.f32 %v1251_v40, %v1247_v38 }
 0x7f7   :  { %v127_v30 = vpop.permute.xlu1 %126 }
 0x7f8   :  { %v129_v34 = vadd.f32 %v127_v30, %v1904_v23 }
 0x7fa   :  { %v1380_v36 = vsel %vm65_vm14, %v129_v34, 0.0 }
 0x7fb   :  { %1381 = vadd.xlane.f32.xlu0 %v1380_v36  ;;  %v1384_v6 = vmul.f32 %v1380_v36, %v1380_v36  ;;  %v1367_v49 = vpop.permute.xlu1 %1366 }
 0x7ff   :  { %v1398_v55 = vpop.permute.xlu1 %1397 }
 0x884   :  { %v1382_v43 = vpop.xlane.xlu0 %1381 }
 0x885   :  { %v1383_v56 = vmul.f32 0.020833334, %v1382_v43 }
 0x887   :  { %v1388_v63 = vmul.f32 %v1383_v56, %v1383_v56  ;;  %v1391_v8 = vsub.f32 %v129_v34, %v1383_v56 }
 0x8a4   :  { %v1500_v41 = vpop.f32.mrf.mxu1 }
 0x8a6   :  { %v1501_v42 = vpop.f32.mrf.mxu1 }
 0x8a7   :  { %v1502_v45 = vadd.f32 %v1501_v42, %v1500_v41 }
 0x8a8   :  { %v1503_v46 = vpop.f32.mrf.mxu1 }
 0x8a9   :  { %v1304_v31 = vadd.f32 %v1502_v45, %v1252_v44 }
 0x8aa   :  { %v1504_v47 = vpop.f32.mrf.mxu1 }
 0x8ab   :  { %v1343_v48 = vpop.f32.mrf.mxu0 }
 0x8ac   :  { %v1344_v23 = vadd.f32 %v1343_v48, %v1304_v31 }
 0x8ad   :  { %v1563_v37 = vpop.f32.mrf.mxu0 }
 0x8ae   :  { %v1349_v20 = vsel %vm65_vm14, %v1344_v23, 0.0 }
 0x8af   :  { %1350 = vadd.xlane.f32.xlu0 %v1349_v20  ;;  %v1353_v35 = vmul.f32 %v1349_v20, %v1349_v20  ;;  %v1346_v50 = vpop.f32.mrf.mxu0 }
 0x8b1   :  { %1354 = vadd.xlane.f32.xlu1 %v1353_v35  ;;  %v1564_v39 = vpop.f32.mrf.mxu0 }
 0x8b3   :  { %1385 = vadd.xlane.f32.xlu0 %v1384_v6 }
 0x8c2   :  { %1403 = vperm.xlu1 %1589, %v1379_v26  }
 0x8c9   :  { %1372 = vperm.xlu0 %1588, %v1013_v51  }
 0x938   :  { %v1351_v54 = vpop.xlane.xlu0 %1350 }
 0x939   :  { %v1352_v57 = vmul.f32 0.020833334, %v1351_v54 }
 0x93a   :  { %v1355_v58 = vpop.xlane.xlu1 %1354 }
 0x93b   :  { %v1357_v59 = vmul.f32 %v1352_v57, %v1352_v57  ;;  %v1356_v60 = vmul.f32 0.020833334, %v1355_v58  ;;  %v1360_v53 = vsub.f32 %v1344_v23, %v1352_v57 }
 0x93c   :  { %v1386_v61 = vpop.xlane.xlu0 %1385 }
 0x93d   :  { %v1358_v1 = vsub.f32 %v1356_v60, %v1357_v59  ;;  %v1387_v62 = vmul.f32 0.020833334, %v1386_v61 }
 0x93e   :  { %v1404_v9 = vpop.permute.xlu1 %1403 }
 0x93f   :  { %v1359_v4 = vmax.f32 %v1358_v1, 0.0  ;;  %v1389_v3 = vsub.f32 %v1387_v62, %v1388_v63 }
 0x941   :  { %v1361_v7 = vadd.f32 1e-05, %v1359_v4  ;;  %v1390_v52 = vmax.f32 %v1389_v3, 0.0 }
 0x943   :  { %1600 = vrsqrt.f32 %v1361_v7  ;;  %v1392_v0 = vadd.f32 1e-05, %v1390_v52 }
 0x944   :  { %v1373_v15 = vpop.permute.xlu0 %1372 }
 0x945   :  { %1602 = vrsqrt.f32 %v1392_v0 }
 0x950   :  { %v1601_v10 = vpop.eup %1600 }
 0x951   :  { %v1363_v11 = vmul.f32 %v1601_v10, %v1360_v53 }
 0x952   :  { %v1603_v12 = vpop.eup %1602 }
 0x953   :  { %v1394_v13 = vmul.f32 %v1603_v12, %v1391_v8  ;;  %v1369_v14 = vmul.f32 %v1367_v49, %v1363_v11 }
 0x955   :  { %v1400_v16 = vmul.f32 %v1398_v55, %v1394_v13  ;;  %v1375_v17 = vadd.f32 %v1373_v15, %v1369_v14 }
 0x957   :  { %v1406_v19 = vadd.f32 %v1404_v9, %v1400_v16  ;;  %v1376_v21 = vmax.f32 %v1375_v17, 0.0 }
 0x959   :  { %v1377_v22 = vsel %vm65_vm14, %v1376_v21, 0.0 }
 0x95a   :  { %v1407_v5 = vadd.f32 %v1406_v19, %v1377_v22 }
 0x95c   :  { %v1408_v24 = vmax.f32 %v1407_v5, 0.0 }
 0x95e   :  { %1409 = vst [vmem:[%s2436_s19] sm:$0xff] %v1408_v24 }

</bundles_post_ra>
